<compile_context>
chip_gen: v7x
topology: tpu7x:2x2x1
jax: 0.10.0
libtpu: 0.0.40
codegen_flags: <defaults>
</compile_context>

<pallas_src>
import functools

import jax
import jax.numpy as jnp
from jax import lax
from jax.experimental import pallas as pl
from jax.experimental.pallas import tpu as pltpu


def _round_up(x, m):
    return (x + m - 1) // m * m


# ----------------------------- Pallas kernel ------------------------------ #
def fused_gcn_kernel(a_ref, xw1_ref, b1_ref, w2_ref, b2_ref,   # inputs
                     o_ref,                                    # output
                     hw2_ref, acc_ref,                         # scratch
                     *, out_c, tm, tk, hid_pad, out_pad):
    # Grid = (phase, row tile, K reduction tile); grid runs sequentially.
    #   phase 0: acc = A[i,:] @ XW1 ; epilogue: HW2[i,:] = relu(acc+b1) @ W2
    #   phase 1: acc = A[i,:] @ HW2 ; epilogue: out[i,:] = log_softmax(acc+b2)
    phase = pl.program_id(0)
    i = pl.program_id(1)
    k = pl.program_id(2)
    k_last = pl.num_programs(2) - 1

    i_start = pl.multiple_of(i * tm, tm)
    k_start = pl.multiple_of(k * tk, tk)

    @pl.when(k == 0)
    def _init_acc():
        acc_ref[...] = jnp.zeros_like(acc_ref)

    @pl.when(phase == 0)
    def _conv1():
        # acc += A[i, k] @ XW1[k]  (XW1 precomputed in the wrapper, VMEM-resident)
        acc_ref[:, :hid_pad] += jnp.dot(
            a_ref[...], xw1_ref[pl.ds(k_start, tk), :],
            preferred_element_type=jnp.float32)

        @pl.when(k == k_last)
        def _finalize1():
            h = jnp.maximum(acc_ref[:, :hid_pad] + b1_ref[...], 0.0)   # bias + ReLU
            # Fused second feature transform: H @ W2 goes straight into the
            # persistent VMEM cache consumed by phase 1 (no H scratch, no
            # second transform pass, no HBM round trip).
            hw2 = jnp.dot(h.astype(w2_ref.dtype), w2_ref[...],
                          preferred_element_type=jnp.float32)
            hw2_ref[pl.ds(i_start, tm), :] = hw2.astype(hw2_ref.dtype)

    @pl.when(phase == 1)
    def _conv2():
        # acc += A[i, k] @ HW2[k]
        acc_ref[:, :out_pad] += jnp.dot(
            a_ref[...], hw2_ref[pl.ds(k_start, tk), :],
            preferred_element_type=jnp.float32)

        @pl.when(k == k_last)
        def _finalize2():
            z = acc_ref[:, :out_pad] + b2_ref[...]
            # Mask padded logit lanes so they do not corrupt the normalizer.
            col = lax.broadcasted_iota(jnp.int32, z.shape, 1)
            z = jnp.where(col < out_c, z, jnp.float32(-1e30))
            m = jnp.max(z, axis=1, keepdims=True)
            s = z - m
            lse = jnp.log(jnp.sum(jnp.exp(s), axis=1, keepdims=True))
            o_ref[...] = (s - lse).astype(o_ref.dtype)


# ------------------------------- wrapper ----------------------------------- #
def gcn_forward(x, edge_index, params, *, tile=256):
    """Fused 2-layer GCN: log_softmax(A @ relu(A @ X W1 + b1) W2 + b2, axis=1)."""
    (w1, b1), (w2, b2) = params
    n, f_in = x.shape
    hid = w1.shape[1]
    out_c = w2.shape[1]

    tm = tk = tile
    n_pad = _round_up(n, tile)
    hid_pad = _round_up(hid, 128)
    out_pad = _round_up(out_c, 128)
    acc_w = max(hid_pad, out_pad)

    a_hat = normalized_adjacency(edge_index, n)

    # Precompute X@W1 once in f32 (XLA, roofline); only the result is streamed
    # into the kernel, so X / W1 HBM traffic disappears from the Pallas grid.
    xw1 = jnp.dot(x, w1, preferred_element_type=jnp.float32)          # (n, hid)

    # bf16 streamed operands (bandwidth + MXU rate); zero padding keeps semantics exact.
    a_p = jnp.zeros((n_pad, n_pad), jnp.bfloat16).at[:n, :n].set(a_hat.astype(jnp.bfloat16))
    xw1_p = jnp.zeros((n_pad, hid_pad), jnp.bfloat16).at[:n, :hid].set(xw1.astype(jnp.bfloat16))
    w2_p = jnp.zeros((hid_pad, out_pad), jnp.bfloat16).at[:hid, :out_c].set(w2.astype(jnp.bfloat16))
    b1_p = jnp.zeros((1, hid_pad), jnp.float32).at[0, :hid].set(b1)
    b2_p = jnp.zeros((1, out_pad), jnp.float32).at[0, :out_c].set(b2)

    grid = (2, n_pad // tm, n_pad // tk)   # (phase, row tiles, K-reduction tiles)

    kernel = functools.partial(fused_gcn_kernel, out_c=out_c, tm=tm, tk=tk,
                               hid_pad=hid_pad, out_pad=out_pad)

    out = pl.pallas_call(
        kernel,
        out_shape=jax.ShapeDtypeStruct((n_pad, out_pad), jnp.float32),
        grid=grid,
        in_specs=[
            # A_hat tile; streamed once per phase.
            # TODO(synk): few-% candidates: pipeline_mode=pl.Buffered(3) here, and
            # keeping the whole bf16 A_hat VMEM-resident for small graphs on
            # v5e/v6e (128 MiB VMEM); block-sparse A via scalar prefetch for
            # large real graphs.
            pl.BlockSpec((tm, tk), lambda p, i, k: (i, k)),
            # XW1 resident: constant block index -> DMA'd once, reused every step.
            pl.BlockSpec((n_pad, hid_pad), lambda p, i, k: (0, 0)),
            pl.BlockSpec((1, hid_pad), lambda p, i, k: (0, 0)),        # b1
            pl.BlockSpec((hid_pad, out_pad), lambda p, i, k: (0, 0)),  # W2
            pl.BlockSpec((1, out_pad), lambda p, i, k: (0, 0)),        # b2
        ],
        # Phase-aware output index: pinned at block (0,0) through phase 0 (never
        # written there), so there is no zero-fill and each output row tile is
        # flushed to HBM exactly once, after its phase-1 epilogue.
        out_specs=pl.BlockSpec((tm, out_pad), lambda p, i, k: (i * p, 0)),
        scratch_shapes=[
            pltpu.VMEM((n_pad, out_pad), jnp.bfloat16),   # HW2 cache, persists phase0 -> phase1
            pltpu.VMEM((tm, acc_w), jnp.float32),         # f32 accumulator for the K reduction
        ],
        compiler_params=pltpu.CompilerParams(
            # Phase 1 consumes the HW2 scratch written in phase 0 and k is a
            # reduction, so the grid must run sequentially on one TensorCore.
            # TODO(synk): on v7x, split into two pallas_calls with a "parallel"
            # row axis (H via HBM) to use both TensorCores for large graphs.
            dimension_semantics=("arbitrary", "arbitrary", "arbitrary"),
            # 48 MiB scoped VMEM: above the 16/32 MiB defaults, safely under
            # v7x's 64 MiB physical VMEM (plenty on v5e/v6e's 128 MiB).
            vmem_limit_bytes=48 * 1024 * 1024,
        ),
    )(a_p, xw1_p, b1_p, w2_p, b2_p)

    return out[:n, :out_c]


# ------------------------------- JAX glue ---------------------------------- #
def normalized_adjacency(edge_index, num_nodes):
    """Dense GCN norm D^-1/2 (A + I) D^-1/2; messages src -> dst, scatter-add edges."""
    src, dst = edge_index[0], edge_index[1]
    a = jnp.zeros((num_nodes, num_nodes), jnp.float32)
    a = a.at[dst, src].add(1.0)                     # keep parallel-edge multiplicity (PyG-like)
    a = a + jnp.eye(num_nodes, dtype=jnp.float32)   # self loops
    deg = jnp.sum(a, axis=1)
    d_inv_sqrt = jnp.where(deg > 0, 1.0 / jnp.sqrt(deg), 0.0)
    return d_inv_sqrt[:, None] * a * d_inv_sqrt[None, :]


def glorot(key, fan_in, fan_out):
    limit = jnp.sqrt(6.0 / (fan_in + fan_out))
    return jax.random.uniform(key, (fan_in, fan_out), jnp.float32, -limit, limit)


def gcn_reference(x, edge_index, params):
    (w1, b1), (w2, b2) = params
    a_hat = normalized_adjacency(edge_index, x.shape[0])
    h = jnp.maximum(a_hat @ (x @ w1) + b1, 0.0)
    z = a_hat @ (h @ w2) + b2
    return jax.nn.log_softmax(z, axis=1)


# --------------------------------- main ------------------------------------ #
if __name__ == "__main__":
    # TODO(synk): the original script loads the Cora edge list from disk via
    # pandas; replaced with a synthetic deterministic random graph.
    N, IN_C, HID, OUT_C, E = 16, 8, 32, 4, 40

    key = jax.random.PRNGKey(0)
    kx, ke, kw1, kw2 = jax.random.split(key, 4)

    x = jax.random.normal(kx, (N, IN_C), jnp.float32)
    edge_index = jax.random.randint(ke, (2, E), 0, N, dtype=jnp.int32)

    # PyG GCNConv-style init: glorot weights, zero bias.
    w1 = glorot(kw1, IN_C, HID)
    b1 = jnp.zeros((HID,), jnp.float32)
    w2 = glorot(kw2, HID, OUT_C)
    b2 = jnp.zeros((OUT_C,), jnp.float32)
    params = ((w1, b1), (w2, b2))

    out = gcn_forward(x, edge_index, params)
    jax.block_until_ready(out)

    assert out.shape == (N, OUT_C)
    assert bool(jnp.all(jnp.isfinite(out)))
    # log_softmax rows must normalize (padded lanes masked correctly)
    row_sums = jnp.sum(jnp.exp(out), axis=1)
    assert bool(jnp.all(jnp.abs(row_sums - 1.0) < 1e-3))
    # bf16-streamed fused kernel vs f32 pure-JAX reference (loose tol for bf16 cast)
    ref = gcn_reference(x, edge_index, params)
    max_err = float(jnp.max(jnp.abs(out - ref)))
    assert max_err < 0.2, max_err
    print("KERNEL_OK")
</pallas_src>

<mosaic_0001>
module attributes {stable_mosaic.version = 11 : i64} {
  func.func @fused_gcn_kernel(%arg0: i32, %arg1: i32, %arg2: i32, %arg3: memref<256x256xbf16, #tpu.memory_space<vmem>>, %arg4: memref<256x128xbf16, #tpu.memory_space<vmem>>, %arg5: memref<1x128xf32, #tpu.memory_space<vmem>>, %arg6: memref<128x128xbf16, #tpu.memory_space<vmem>>, %arg7: memref<1x128xf32, #tpu.memory_space<vmem>>, %arg8: memref<256x128xf32, #tpu.memory_space<vmem>>, %arg9: memref<256x128xbf16, #tpu.memory_space<vmem>>, %arg10: memref<256x128xf32, #tpu.memory_space<vmem>>) attributes {dimension_semantics = [#tpu.dimension_semantics<arbitrary>, #tpu.dimension_semantics<arbitrary>, #tpu.dimension_semantics<arbitrary>], iteration_bounds = array<i64: 2, 1, 1>, scalar_prefetch = 0 : i64, scratch_operands = 2 : i64, tpu.core_type = #tpu.core_type<tc>, window_params = [{transform_indices = @transform_0, window_bounds = array<i64: 256, 256>}, {pipeline_mode = #tpu.pipeline_mode<synchronous>, transform_indices = @transform_1, window_bounds = array<i64: 256, 128>}, {pipeline_mode = #tpu.pipeline_mode<synchronous>, transform_indices = @transform_2, window_bounds = array<i64: 1, 128>}, {pipeline_mode = #tpu.pipeline_mode<synchronous>, transform_indices = @transform_3, window_bounds = array<i64: 128, 128>}, {pipeline_mode = #tpu.pipeline_mode<synchronous>, transform_indices = @transform_4, window_bounds = array<i64: 1, 128>}, {transform_indices = @transform_5, window_bounds = array<i64: 256, 128>}]} {
    %c256_i32 = arith.constant 256 : i32
    %0 = arith.muli %arg1, %c256_i32 : i32
    %1 = tpu.assume_multiple %0, 256 : i32
    %c256_i32_0 = arith.constant 256 : i32
    %2 = arith.muli %arg2, %c256_i32_0 : i32
    %3 = tpu.assume_multiple %2, 256 : i32
    %c0_i32 = arith.constant 0 : i32
    %4 = arith.cmpi eq, %arg2, %c0_i32 : i32
    %5 = arith.extui %4 : i1 to i32
    %c0_i32_1 = arith.constant 0 : i32
    %6 = arith.cmpi ne, %5, %c0_i32_1 : i32
    scf.if %6 {
      %cst = arith.constant 0.000000e+00 : f32
      %13 = vector.broadcast %cst : f32 to vector<256x128xf32>
      %c0 = arith.constant 0 : index
      %c0_5 = arith.constant 0 : index
      %14 = vector.load %arg10[%c0, %c0_5] : memref<256x128xf32, #tpu.memory_space<vmem>>, vector<256x128xf32>
      tpu.vector_store %arg10[%c0, %c0_5], %13 {strides = array<i32>} : memref<256x128xf32, #tpu.memory_space<vmem>>, vector<256x128xf32>,
    } else {
    }
    %c0_i32_2 = arith.constant 0 : i32
    %7 = arith.cmpi eq, %arg0, %c0_i32_2 : i32
    %8 = arith.extui %7 : i1 to i32
    %c0_i32_3 = arith.constant 0 : i32
    %9 = arith.cmpi ne, %8, %c0_i32_3 : i32
    scf.if %9 {
      %c0 = arith.constant 0 : index
      %c0_5 = arith.constant 0 : index
      %13 = vector.load %arg10[%c0, %c0_5] : memref<256x128xf32, #tpu.memory_space<vmem>>, vector<256x128xf32>
      %c0_6 = arith.constant 0 : index
      %c0_7 = arith.constant 0 : index
      %14 = vector.load %arg3[%c0_6, %c0_7] : memref<256x256xbf16, #tpu.memory_space<vmem>>, vector<256x256xbf16>
      %15 = arith.index_cast %3 : i32 to index
      %c0_8 = arith.constant 0 : index
      %16 = vector.load %arg4[%15, %c0_8] : memref<256x128xbf16, #tpu.memory_space<vmem>>, vector<256x128xbf16>
      %cst = arith.constant dense<0.000000e+00> : vector<256x128xf32>
      %17 = tpu.matmul %14, %16, %cst {dimension_numbers = #tpu.dot_dimension_numbers<[1], [0], [0], [1], [0, 0, 1, 1], [], []>} : vector<256x256xbf16>, vector<256x128xbf16>, vector<256x128xf32> -> vector<256x128xf32>
      %18 = arith.addf %13, %17 : vector<256x128xf32>
      %c0_9 = arith.constant 0 : index
      %c0_10 = arith.constant 0 : index
      %19 = vector.load %arg10[%c0_9, %c0_10] : memref<256x128xf32, #tpu.memory_space<vmem>>, vector<256x128xf32>
      tpu.vector_store %arg10[%c0_9, %c0_10], %18 {strides = array<i32>} : memref<256x128xf32, #tpu.memory_space<vmem>>, vector<256x128xf32>,
      %c0_i32_11 = arith.constant 0 : i32
      %20 = arith.cmpi eq, %arg2, %c0_i32_11 : i32
      %21 = arith.extui %20 : i1 to i32
      %c0_i32_12 = arith.constant 0 : i32
      %22 = arith.cmpi ne, %21, %c0_i32_12 : i32
      scf.if %22 {
        %c0_13 = arith.constant 0 : index
        %c0_14 = arith.constant 0 : index
        %23 = vector.load %arg10[%c0_13, %c0_14] : memref<256x128xf32, #tpu.memory_space<vmem>>, vector<256x128xf32>
        %c0_15 = arith.constant 0 : index
        %c0_16 = arith.constant 0 : index
        %24 = vector.load %arg5[%c0_15, %c0_16] : memref<1x128xf32, #tpu.memory_space<vmem>>, vector<1x128xf32>
        %25 = vector.broadcast %24 : vector<1x128xf32> to vector<256x128xf32>
        %26 = arith.addf %23, %25 : vector<256x128xf32>
        %cst_17 = arith.constant 0.000000e+00 : f32
        %27 = vector.broadcast %cst_17 : f32 to vector<256x128xf32>
        %28 = arith.maximumf %26, %27 : vector<256x128xf32>
        %29 = arith.truncf %28 : vector<256x128xf32> to vector<256x128xbf16>
        %c0_18 = arith.constant 0 : index
        %c0_19 = arith.constant 0 : index
        %30 = vector.load %arg6[%c0_18, %c0_19] : memref<128x128xbf16, #tpu.memory_space<vmem>>, vector<128x128xbf16>
        %cst_20 = arith.constant dense<0.000000e+00> : vector<256x128xf32>
        %31 = tpu.matmul %29, %30, %cst_20 {dimension_numbers = #tpu.dot_dimension_numbers<[1], [0], [0], [1], [0, 0, 1, 1], [], []>} : vector<256x128xbf16>, vector<128x128xbf16>, vector<256x128xf32> -> vector<256x128xf32>
        %32 = arith.truncf %31 : vector<256x128xf32> to vector<256x128xbf16>
        %33 = arith.index_cast %1 : i32 to index
        %c0_21 = arith.constant 0 : index
        %34 = vector.load %arg9[%33, %c0_21] : memref<256x128xbf16, #tpu.memory_space<vmem>>, vector<256x128xbf16>
        tpu.vector_store %arg9[%33, %c0_21], %32 {strides = array<i32>} : memref<256x128xbf16, #tpu.memory_space<vmem>>, vector<256x128xbf16>,
      } else {
      }
    } else {
    }
    %c1_i32 = arith.constant 1 : i32
    %10 = arith.cmpi eq, %arg0, %c1_i32 : i32
    %11 = arith.extui %10 : i1 to i32
    %c0_i32_4 = arith.constant 0 : i32
    %12 = arith.cmpi ne, %11, %c0_i32_4 : i32
    scf.if %12 {
      %c0 = arith.constant 0 : index
      %c0_5 = arith.constant 0 : index
      %13 = vector.load %arg10[%c0, %c0_5] : memref<256x128xf32, #tpu.memory_space<vmem>>, vector<256x128xf32>
      %c0_6 = arith.constant 0 : index
      %c0_7 = arith.constant 0 : index
      %14 = vector.load %arg3[%c0_6, %c0_7] : memref<256x256xbf16, #tpu.memory_space<vmem>>, vector<256x256xbf16>
      %15 = arith.index_cast %3 : i32 to index
      %c0_8 = arith.constant 0 : index
      %16 = vector.load %arg9[%15, %c0_8] : memref<256x128xbf16, #tpu.memory_space<vmem>>, vector<256x128xbf16>
      %cst = arith.constant dense<0.000000e+00> : vector<256x128xf32>
      %17 = tpu.matmul %14, %16, %cst {dimension_numbers = #tpu.dot_dimension_numbers<[1], [0], [0], [1], [0, 0, 1, 1], [], []>} : vector<256x256xbf16>, vector<256x128xbf16>, vector<256x128xf32> -> vector<256x128xf32>
      %18 = arith.addf %13, %17 : vector<256x128xf32>
      %c0_9 = arith.constant 0 : index
      %c0_10 = arith.constant 0 : index
      %19 = vector.load %arg10[%c0_9, %c0_10] : memref<256x128xf32, #tpu.memory_space<vmem>>, vector<256x128xf32>
      tpu.vector_store %arg10[%c0_9, %c0_10], %18 {strides = array<i32>} : memref<256x128xf32, #tpu.memory_space<vmem>>, vector<256x128xf32>,
      %c0_i32_11 = arith.constant 0 : i32
      %20 = arith.cmpi eq, %arg2, %c0_i32_11 : i32
      %21 = arith.extui %20 : i1 to i32
      %c0_i32_12 = arith.constant 0 : i32
      %22 = arith.cmpi ne, %21, %c0_i32_12 : i32
      scf.if %22 {
        %c0_13 = arith.constant 0 : index
        %c0_14 = arith.constant 0 : index
        %23 = vector.load %arg10[%c0_13, %c0_14] : memref<256x128xf32, #tpu.memory_space<vmem>>, vector<256x128xf32>
        %c0_15 = arith.constant 0 : index
        %c0_16 = arith.constant 0 : index
        %24 = vector.load %arg7[%c0_15, %c0_16] : memref<1x128xf32, #tpu.memory_space<vmem>>, vector<1x128xf32>
        %25 = vector.broadcast %24 : vector<1x128xf32> to vector<256x128xf32>
        %26 = arith.addf %23, %25 : vector<256x128xf32>
        %27 = tpu.iota {dimensions = array<i32: 1>} : vector<256x128xi32>
        %c4_i32 = arith.constant 4 : i32
        %28 = vector.broadcast %c4_i32 : i32 to vector<256x128xi32>
        %29 = arith.cmpi slt, %27, %28 : vector<256x128xi32>
        %cst_17 = arith.constant -1.000000e+30 : f32
        %30 = vector.broadcast %cst_17 : f32 to vector<256x128xf32>
        %31 = arith.select %29, %26, %30 : vector<256x128xi1>, vector<256x128xf32>
        %cst_18 = arith.constant dense<0xFF800000> : vector<256xf32>
        %32 = vector.multi_reduction <maximumf>, %31, %cst_18 [1] : vector<256x128xf32> to vector<256xf32>
        %33 = vector.shape_cast %32 : vector<256xf32> to vector<256x1xf32>
        %34 = vector.broadcast %33 : vector<256x1xf32> to vector<256x128xf32>
        %35 = arith.subf %31, %34 : vector<256x128xf32>
        %36 = math.exp %35 : vector<256x128xf32>
        %cst_19 = arith.constant dense<0.000000e+00> : vector<256xf32>
        %37 = vector.multi_reduction <add>, %36, %cst_19 [1] : vector<256x128xf32> to vector<256xf32>
        %38 = vector.shape_cast %37 : vector<256xf32> to vector<256x1xf32>
        %39 = math.log %38 : vector<256x1xf32>
        %40 = vector.broadcast %39 : vector<256x1xf32> to vector<256x128xf32>
        %41 = arith.subf %35, %40 : vector<256x128xf32>
        %c0_20 = arith.constant 0 : index
        %c0_21 = arith.constant 0 : index
        %42 = vector.load %arg8[%c0_20, %c0_21] : memref<256x128xf32, #tpu.memory_space<vmem>>, vector<256x128xf32>
        tpu.vector_store %arg8[%c0_20, %c0_21], %41 {strides = array<i32>} : memref<256x128xf32, #tpu.memory_space<vmem>>, vector<256x128xf32>,
      } else {
      }
    } else {
    }
    return
  }
  func.func @transform_0(%arg0: i32, %arg1: i32, %arg2: i32) -> (i32, i32) {
    %c0_i32 = arith.constant 0 : i32
    return %arg1, %arg2 : i32, i32
  }
  func.func @transform_1(%arg0: i32, %arg1: i32, %arg2: i32) -> (i32, i32) {
    %c0_i32 = arith.constant 0 : i32
    %c0_i32_0 = arith.constant 0 : i32
    %c0_i32_1 = arith.constant 0 : i32
    return %c0_i32, %c0_i32_0 : i32, i32
  }
  func.func @transform_2(%arg0: i32, %arg1: i32, %arg2: i32) -> (i32, i32) {
    %c0_i32 = arith.constant 0 : i32
    %c0_i32_0 = arith.constant 0 : i32
    %c0_i32_1 = arith.constant 0 : i32
    return %c0_i32, %c0_i32_0 : i32, i32
  }
  func.func @transform_3(%arg0: i32, %arg1: i32, %arg2: i32) -> (i32, i32) {
    %c0_i32 = arith.constant 0 : i32
    %c0_i32_0 = arith.constant 0 : i32
    %c0_i32_1 = arith.constant 0 : i32
    return %c0_i32, %c0_i32_0 : i32, i32
  }
  func.func @transform_4(%arg0: i32, %arg1: i32, %arg2: i32) -> (i32, i32) {
    %c0_i32 = arith.constant 0 : i32
    %c0_i32_0 = arith.constant 0 : i32
    %c0_i32_1 = arith.constant 0 : i32
    return %c0_i32, %c0_i32_0 : i32, i32
  }
  func.func @transform_5(%arg0: i32, %arg1: i32, %arg2: i32) -> (i32, i32) {
    %0 = arith.muli %arg1, %arg0 : i32
    %c0_i32 = arith.constant 0 : i32
    %c0_i32_0 = arith.constant 0 : i32
    return %0, %c0_i32 : i32, i32
  }
}

</mosaic_0001>

<bundles_post_ra>
// kernel: tpu_custom_call.1
= control target key start
LH: loop header
LB: loop body
LE: loop exit
PB: predicated region body
PF: predicated region fallthrough
CT: control target
= control target key end

     0   :  { %10 = vsyncpa [#allocation5], 0  ;;  %s3856_s0 = inlined_call_operand.hbm [shape: bf16[256,256], index: 0, kind: input, shape index: {}]   ;;  %s3857_s1 = inlined_call_operand.hbm [shape: bf16[256,128], index: 1, kind: input, shape index: {}]   ;;  %s3858_s2 = inlined_call_operand.vmem [shape: f32[1,128], index: 2, kind: input, shape index: {}]   ;;  %s3859_s3 = inlined_call_operand.hbm [shape: bf16[128,128], index: 3, kind: input, shape index: {}]   ;;  %s3860_s4 = inlined_call_operand.vmem [shape: f32[1,128], index: 4, kind: input, shape index: {}]   ;;  %s3861_s5 = inlined_call_operand.hbm [shape: f32[256,128], index: 5, kind: output, shape index: {}]  }
   0x1   :  { %11 = vsyncpa [#allocation8], 0 }
   0x2   :  { %12 = vsyncpa [#allocation6], 0 }
   0x3   :  { %14 = vsyncpa [#allocation6 + $0x1], 0  ;;  %s3287_s18 = smov 0   ;;  %s3289_s19 = smov 0  }
   0x4   :  { %s3291_s20 = smov 0  }
   0x5 LB: > { %s3246_s21 = smov [#allocation7]   ;;  %s2344_s23 = sadd.s32 4294967295, %s3244_s20   ;;  %s3244_s20 = sphi %s3291_s20, %s20_s20   ;;  %s3240_s19 = sphi %s3289_s19, %s3876_s19   ;;  %s3236_s18 = sphi %s3287_s18, %s3875_s18  }
   0x6   : > { %s215_s22 = sshll.u32 %s3246_s21, 4  ;;  %p2346_p0 = scmp.ge.s32.totalorder %s3244_s20, 1  ;;  %s216_s22 = int_to_ptr.vmem [resolvable:$true] %s215_s22 }
   0x7   : > { %p184_p1 = scmp.lt.s32.totalorder %s3244_s20, 3  ;;  %p3308_p2 = scmp.eq.s32.totalorder %s2344_s23, 0 }
   0x8   : > { %s39_s28 = sadd.s32 1, %s3240_s19  ;;  %s3100_s7 = scalar_lea.hbm %s3857_s1, 2048 }
   0x9   : > { %s3865_s25 = scalar_select %p3308_p2, 1, 0 }
   0xa   : > { %p3312_p3 = pnand %p2346_p0, %p184_p1  ;;  %p3325_p6 = scmp.ge.s32.totalorder %s39_s28, 2 }
   0xb   : > { %p3101_p7 = scmp.ne.s32.totalorder %s3857_s1, %s3100_s7  ;;  %p3107_p11 = scmp.lt.u32.totalorder %s3100_s7, %s3857_s1 }
   0xc   : > { %s3866_s26 = scalar_select %p3312_p3, 1, 0 }
   0xd   : > { %p2794_p4 = pneg %p3312_p3 }
   0xe   : > { %s3868_s29 = scalar_select %p3325_p6, 1, 0 }
   0xf   : > { %p3320_p5 = pnand %p3308_p2, %p2794_p4 }
  0x11   : > { %p3337_p8 = pneg %p3320_p5 }
  0x13   : > { %p3103_p9 = pnand %p3337_p8, %p3101_p7 }
  0x15   : > { %p3104_p10 = pneg %p3103_p9 }
  0x17   : > { %p3109_p12 = pnand %p3107_p11, %p3104_p10 }
  0x19   : > { %3112 = shalt.err (!%p3109_p12)
}
  0x1a   : > { %s3113_s13 = scalar_lea.vmem %s216_s22, 2048  ;;  %p3121_p4 = scmp.lt.s32.totalorder %s216_s22, %s216_s22 }
  0x1b   : > { %p3114_p13 = scmp.ne.s32.totalorder %s216_s22, %s3113_s13  ;;  %p3122_p2 = scmp.lt.s32.totalorder %s3113_s13, %s3113_s13 }
  0x1d   : > { %p3116_p0 = pnand %p3114_p13, %p3337_p8  ;;  %p3123_p3 = por %p3122_p2, %p3121_p4 }
  0x1f   : > { %p3117_p1 = pneg %p3116_p0 }
  0x21   : > { %p3124_p6 = pnand %p3123_p3, %p3117_p1 }
  0x23   : > { %3127 = shalt.err (!%p3124_p6)
}
  0x24   : > { %s3247_s14 = smov 64   ;;  %s3248_s15 = smov 4  }
  0x25   : > { %2800 = dma.hbm_to_vmem [thread:$0]  (!%p3320_p5), %s3857_s1, 2048, %s216_s22, [#allocation8], %s3247_s14, %s3247_s14, %s3248_s15  }
  0x26   : > { %p3870_p7 = scmp.ne.s32.totalorder %s3868_s29, 0  ;;  %s3249_s21 = smov [#allocation4]  }
  0x27   : > { %s202_s30 = sshll.u32 %s3249_s21, 4  ;;  %s3128_s8 = scalar_lea.hbm %s3856_s0, 4096  ;;  %s203_s30 = int_to_ptr.vmem [resolvable:$true] %s202_s30 }
  0x28   : > { %s3878_s28 = smov (%p3870_p7, %s39_s28), 0  ;;  %p3129_p2 = scmp.ne.s32.totalorder %s3856_s0, %s3128_s8 }
  0x29   : > { %p3135_p9 = scmp.lt.u32.totalorder %s3128_s8, %s3856_s0 }
  0x2a   : > { %p3131_p3 = pnand %p3129_p2, %p3337_p8 }
  0x2c   : > { %p3132_p6 = pneg %p3131_p3 }
  0x2e   : > { %p3137_p10 = pnand %p3135_p9, %p3132_p6 }
  0x30   : > { %3140 = shalt.err (!%p3137_p10)
}
  0x31   : > { %s3141_s22 = scalar_lea.vmem %s203_s30, 4096  ;;  %p3149_p0 = scmp.lt.s32.totalorder %s203_s30, %s203_s30 }
  0x32   : > { %p3142_p11 = scmp.ne.s32.totalorder %s203_s30, %s3141_s22  ;;  %p3150_p1 = scmp.lt.s32.totalorder %s3141_s22, %s3141_s22 }
  0x34   : > { %p3144_p12 = pnand %p3142_p11, %p3337_p8  ;;  %p3151_p4 = por %p3150_p1, %p3149_p0 }
  0x36   : > { %p3145_p13 = pneg %p3144_p12 }
  0x38   : > { %p3152_p7 = pnand %p3151_p4, %p3145_p13 }
  0x3a   : > { %3155 = shalt.err (!%p3152_p7)
}
  0x3b   : > { %s3250_s29 = smov 128   ;;  %s3251_s16 = smov 8  }
  0x3c   : > { %2797 = dma.hbm_to_vmem [thread:$0]  (!%p3320_p5), %s3856_s0, 4096, %s203_s30, [#allocation5], %s3250_s29, %s3250_s29, %s3251_s16  }
  0x3d   : > { %s3252_s6 = smov [#allocation9]   ;;  %s3156_s11 = scalar_lea.hbm %s3859_s3, 1024 }
  0x3e   : > { %s231_s7 = sshll.u32 %s3252_s6, 4  ;;  %p3157_p2 = scmp.ne.s32.totalorder %s3859_s3, %s3156_s11  ;;  %s232_s7 = int_to_ptr.vmem [resolvable:$true] %s231_s7 }
  0x3f   : > { %p3163_p9 = scmp.lt.u32.totalorder %s3156_s11, %s3859_s3 }
  0x40   : > { %p3159_p3 = pnand %p3157_p2, %p3337_p8 }
  0x42   : > { %p3160_p6 = pneg %p3159_p3 }
  0x44   : > { %p3165_p10 = pnand %p3163_p9, %p3160_p6 }
  0x46   : > { %3168 = shalt.err (!%p3165_p10)
}
  0x47   : > { %s3169_s30 = scalar_lea.vmem %s232_s7, 1024  ;;  %p3177_p0 = scmp.lt.s32.totalorder %s232_s7, %s232_s7 }
  0x48   : > { %p3170_p11 = scmp.ne.s32.totalorder %s232_s7, %s3169_s30  ;;  %p3178_p1 = scmp.lt.s32.totalorder %s3169_s30, %s3169_s30 }
  0x4a   : > { %p3172_p12 = pnand %p3170_p11, %p3337_p8  ;;  %p3179_p4 = por %p3178_p1, %p3177_p0 }
  0x4c   : > { %p3173_p13 = pneg %p3172_p12 }
  0x4e   : > { %p3180_p7 = pnand %p3179_p4, %p3173_p13 }
  0x50   : > { %3183 = shalt.err (!%p3180_p7)
}
  0x51   : > { %2803 = dma.hbm_to_vmem [thread:$0]  (!%p3320_p5), %s3859_s3, 1024, %s232_s7, [#allocation8], %s3247_s14, %s3247_s14, %s3248_s15  }
  0x52   : > { %p3871_p2 = scmp.ne.s32.totalorder %s3866_s26, 0 }
  0x53   : > { %p3872_p8 = scmp.ne.s32.totalorder (!%p3871_p2), %s3865_s25, 0 }
  0x54   : > { %250 = sbr.rel (%p3871_p2) target bundleno = 1337 (0x539), region = 40 }
  0x5b   : > { %3223 = dma.done.wait (%p3872_p8), [#allocation5], 4096  }
  0x5c   : > { %3225 = vsyncadd (%p3872_p8), [#allocation5], 4294963200 }
  0x5d   : > { %3227 = dma.done.wait (%p3872_p8), [#allocation8], 3072  }
  0x5e   : > { %3229 = vsyncadd (%p3872_p8), [#allocation8], 4294964224  ;;  %v3253_v0 = vmov 0.0   ;;  %p2354_p5 = scmp.ne.s32.totalorder %s3236_s18, 0 }
  0x5f   : > { %292 = vst [vmem:[#allocation3] sm:$0xff] %v3253_v0  ;;  %293 = vst [vmem:[#allocation3 + $0x8] sm:$0xff] %v3253_v0  ;;  %v2852_v1 = vld [vmem:[#allocation7 + $0x40] sm:$0xff] (!%p2354_p5)   ;;  %v2854_v3 = vld [vmem:[#allocation7 + $0x48] sm:$0xff] (!%p2354_p5)  }
  0x60   : > { %294 = vst [vmem:[#allocation3 + $0x10] sm:$0xff] %v3253_v0  ;;  %295 = vst [vmem:[#allocation3 + $0x18] sm:$0xff] %v3253_v0  ;;  %v2853_v2 = vld [vmem:[#allocation7] sm:$0xff] (!%p2354_p5)   ;;  %2450 = vmatprep.subr.bf16.mxu0 (!%p2354_p5), %v2852_v1  ;;  %2746 = vmatprep.subr.bf16.mxu1 (!%p2354_p5), %v2852_v1  ;;  %v2855_v4 = vld [vmem:[#allocation7 + $0x8] sm:$0xff] (!%p2354_p5)  }
  0x61   : > { %296 = vst [vmem:[#allocation3 + $0x20] sm:$0xff] %v3253_v0  ;;  %297 = vst [vmem:[#allocation3 + $0x28] sm:$0xff] %v3253_v0  ;;  %2451 = vmatpush3.bf16.msra.mxu0 (!%p2354_p5), %v2853_v2  ;;  %2754 = vmatpush3.bf16.msra.mxu1 (!%p2354_p5), %v2853_v2  ;;  %v2856_v5 = vld [vmem:[#allocation7 + $0x50] sm:$0xff] (!%p2354_p5)   ;;  %v2858_v7 = vld [vmem:[#allocation7 + $0x58] sm:$0xff] (!%p2354_p5)  }
  0x62   : > { %298 = vst [vmem:[#allocation3 + $0x30] sm:$0xff] %v3253_v0  ;;  %299 = vst [vmem:[#allocation3 + $0x38] sm:$0xff] %v3253_v0  ;;  %2452 = vmatprep.subr.bf16.mxu0 (!%p2354_p5), %v2854_v3  ;;  %2747 = vmatprep.subr.bf16.mxu1 (!%p2354_p5), %v2854_v3  ;;  %v2857_v6 = vld [vmem:[#allocation7 + $0x10] sm:$0xff] (!%p2354_p5)   ;;  %v2859_v8 = vld [vmem:[#allocation7 + $0x18] sm:$0xff] (!%p2354_p5)  }
  0x63   : > { %300 = vst [vmem:[#allocation3 + $0x40] sm:$0xff] %v3253_v0  ;;  %301 = vst [vmem:[#allocation3 + $0x48] sm:$0xff] %v3253_v0  ;;  %v2860_v9 = vld [vmem:[#allocation7 + $0x60] sm:$0xff] (!%p2354_p5)   ;;  %v2862_v11 = vld [vmem:[#allocation7 + $0x68] sm:$0xff] (!%p2354_p5)  }
  0x64   : > { %302 = vst [vmem:[#allocation3 + $0x50] sm:$0xff] %v3253_v0  ;;  %303 = vst [vmem:[#allocation3 + $0x58] sm:$0xff] %v3253_v0  ;;  %v2861_v10 = vld [vmem:[#allocation7 + $0x20] sm:$0xff] (!%p2354_p5)   ;;  %v2863_v13 = vld [vmem:[#allocation7 + $0x28] sm:$0xff] (!%p2354_p5)  }
  0x65   : > { %304 = vst [vmem:[#allocation3 + $0x60] sm:$0xff] %v3253_v0  ;;  %305 = vst [vmem:[#allocation3 + $0x68] sm:$0xff] %v3253_v0  ;;  %2453 = vmatpush3.bf16.msra.mxu0 (!%p2354_p5), %v2855_v4  ;;  %2755 = vmatpush3.bf16.msra.mxu1 (!%p2354_p5), %v2855_v4  ;;  %v2870_v12 = vld [vmem:[#allocation4 + $0x4] ss:$8 sps:$4 sm:$0xff] (!%p2354_p5)   ;;  %v2864_v14 = vld [vmem:[#allocation7 + $0x70] sm:$0xff] (!%p2354_p5)  }
  0x66   : > { %306 = vst [vmem:[#allocation3 + $0x70] sm:$0xff] %v3253_v0  ;;  %307 = vst [vmem:[#allocation3 + $0x78] sm:$0xff] %v3253_v0  ;;  %2454 = vmatprep.subr.bf16.mxu0 (!%p2354_p5), %v2856_v5  ;;  %2748 = vmatprep.subr.bf16.mxu1 (!%p2354_p5), %v2856_v5  ;;  %v2865_v15 = vld [vmem:[#allocation7 + $0x30] sm:$0xff] (!%p2354_p5)   ;;  %v2866_v16 = vld [vmem:[#allocation7 + $0x78] sm:$0xff] (!%p2354_p5)  }
  0x67   : > { %308 = vst [vmem:[#allocation3 + $0x80] sm:$0xff] %v3253_v0  ;;  %309 = vst [vmem:[#allocation3 + $0x88] sm:$0xff] %v3253_v0  ;;  %716 = vmatprep.mubr.bf16.mxu0 (!%p2354_p5), %v2870_v12  ;;  %v2867_v17 = vld [vmem:[#allocation7 + $0x38] sm:$0xff] (!%p2354_p5)   ;;  %v2868_v18 = vld [vmem:[#allocation4] ss:$8 sps:$4 sm:$0xff] (!%p2354_p5)  }
  0x68   : > { %310 = vst [vmem:[#allocation3 + $0x90] sm:$0xff] %v3253_v0  ;;  %311 = vst [vmem:[#allocation3 + $0x98] sm:$0xff] %v3253_v0  ;;  %327 = sbr.rel (%p2354_p5) target bundleno = 675 (0x2a3), region = 60  ;;  %v2900_v19 = vld [vmem:[#allocation4 + $0xc4] ss:$8 sps:$4 sm:$0xff] (!%p2354_p5)   ;;  %v2918_v50 = vld [vmem:[#allocation9 + $0x10] sm:$0xff] (!%p2354_p5)  }
  0x69   : > { %312 = vst [vmem:[#allocation3 + $0xa0] sm:$0xff] %v3253_v0  ;;  %313 = vst [vmem:[#allocation3 + $0xa8] sm:$0xff] %v3253_v0  ;;  %2455 = vmatpush3.bf16.msra.mxu0 (!%p2354_p5), %v2857_v6  ;;  %2756 = vmatpush3.bf16.msra.mxu1 (!%p2354_p5), %v2857_v6  ;;  %v2871_v20 = vld [vmem:[#allocation4 + $0x14] ss:$8 sps:$4 sm:$0xff] (!%p2354_p5)   ;;  %v2898_v21 = vld [vmem:[#allocation4 + $0xc0] ss:$8 sps:$4 sm:$0xff] (!%p2354_p5)  }
  0x6a   : > { %314 = vst [vmem:[#allocation3 + $0xb0] sm:$0xff] %v3253_v0  ;;  %315 = vst [vmem:[#allocation3 + $0xb8] sm:$0xff] %v3253_v0  ;;  %2456 = vmatprep.subr.bf16.mxu0 (!%p2354_p5), %v2858_v7  ;;  %2749 = vmatprep.subr.bf16.mxu1 (!%p2354_p5), %v2858_v7  ;;  %v2904_v22 = vld [vmem:[#allocation4 + $0xd4] ss:$8 sps:$4 sm:$0xff] (!%p2354_p5)   ;;  %v2873_v23 = vld [vmem:[#allocation4 + $0x10] ss:$8 sps:$4 sm:$0xff] (!%p2354_p5)  }
  0x6b   : > { %316 = vst [vmem:[#allocation3 + $0xc0] sm:$0xff] %v3253_v0  ;;  %317 = vst [vmem:[#allocation3 + $0xc8] sm:$0xff] %v3253_v0  ;;  %812 = vmatprep.mubr.bf16.mxu1 (!%p2354_p5), %v2900_v19  ;;  %v2874_v24 = vld [vmem:[#allocation4 + $0x24] ss:$8 sps:$4 sm:$0xff] (!%p2354_p5)   ;;  %v2906_v25 = vld [vmem:[#allocation4 + $0xd0] ss:$8 sps:$4 sm:$0xff] (!%p2354_p5)  }
  0x6c   : > { %318 = vst [vmem:[#allocation3 + $0xd0] sm:$0xff] %v3253_v0  ;;  %319 = vst [vmem:[#allocation3 + $0xd8] sm:$0xff] %v3253_v0  ;;  %v2910_v26 = vld [vmem:[#allocation4 + $0xe4] ss:$8 sps:$4 sm:$0xff] (!%p2354_p5)   ;;  %v2876_v28 = vld [vmem:[#allocation4 + $0x20] ss:$8 sps:$4 sm:$0xff] (!%p2354_p5)  }
  0x6d   : > { %320 = vst [vmem:[#allocation3 + $0xe0] sm:$0xff] %v3253_v0  ;;  %321 = vst [vmem:[#allocation3 + $0xe8] sm:$0xff] %v3253_v0  ;;  %2457 = vmatpush3.bf16.msra.mxu0 (!%p2354_p5), %v2859_v8  ;;  %2757 = vmatpush3.bf16.msra.mxu1 (!%p2354_p5), %v2859_v8  ;;  %v2916_v27 = vld [vmem:[#allocation9] sm:$0xff] (!%p2354_p5)   ;;  %v2877_v29 = vld [vmem:[#allocation4 + $0x34] ss:$8 sps:$4 sm:$0xff] (!%p2354_p5)  }
  0x6e   : > { %322 = vst [vmem:[#allocation3 + $0xf0] sm:$0xff] %v3253_v0  ;;  %323 = vst [vmem:[#allocation3 + $0xf8] sm:$0xff] %v3253_v0  ;;  %2458 = vmatprep.subr.bf16.mxu0 (!%p2354_p5), %v2860_v9  ;;  %2750 = vmatprep.subr.bf16.mxu1 (!%p2354_p5), %v2860_v9  ;;  %v2912_v30 = vld [vmem:[#allocation4 + $0xe0] ss:$8 sps:$4 sm:$0xff] (!%p2354_p5)   ;;  %v2913_v31 = vld [vmem:[#allocation4 + $0xf4] ss:$8 sps:$4 sm:$0xff] (!%p2354_p5)  }
  0x6f   : > { %v2879_v32 = vld [vmem:[#allocation4 + $0x30] ss:$8 sps:$4 sm:$0xff]   ;;  %v2880_v33 = vld [vmem:[#allocation4 + $0x44] ss:$8 sps:$4 sm:$0xff]   ;;  %v2882_v35 = vld [vmem:[#allocation4 + $0x40] ss:$8 sps:$4 sm:$0xff]  }
  0x70   : > { %v2915_v34 = vld [vmem:[#allocation4 + $0xf0] ss:$8 sps:$4 sm:$0xff]   ;;  %v2883_v36 = vld [vmem:[#allocation4 + $0x54] ss:$8 sps:$4 sm:$0xff]   ;;  %v2886_v38 = vld [vmem:[#allocation4 + $0x64] ss:$8 sps:$4 sm:$0xff]  }
  0x71   : > { %2459 = vmatpush3.bf16.msra.mxu0 %v2861_v10  ;;  %2758 = vmatpush3.bf16.msra.mxu1 %v2861_v10  ;;  %v2885_v37 = vld [vmem:[#allocation4 + $0x50] ss:$8 sps:$4 sm:$0xff]   ;;  %v2888_v39 = vld [vmem:[#allocation4 + $0x60] ss:$8 sps:$4 sm:$0xff]   ;;  %v2889_v40 = vld [vmem:[#allocation4 + $0x74] ss:$8 sps:$4 sm:$0xff]  }
  0x72   : > { %2460 = vmatprep.subr.bf16.mxu0 %v2862_v11  ;;  %2751 = vmatprep.subr.bf16.mxu1 %v2862_v11  ;;  %v2891_v41 = vld [vmem:[#allocation4 + $0x70] ss:$8 sps:$4 sm:$0xff]   ;;  %v2892_v42 = vld [vmem:[#allocation4 + $0x84] ss:$8 sps:$4 sm:$0xff]   ;;  %v2894_v43 = vld [vmem:[#allocation4 + $0x80] ss:$8 sps:$4 sm:$0xff]  }
  0x73   : > { %v2895_v44 = vld [vmem:[#allocation4 + $0x94] ss:$8 sps:$4 sm:$0xff]   ;;  %v2897_v45 = vld [vmem:[#allocation4 + $0x90] ss:$8 sps:$4 sm:$0xff]   ;;  %v2901_v46 = vld [vmem:[#allocation4 + $0xa4] ss:$8 sps:$4 sm:$0xff]  }
  0x74   : > { %v2917_v47 = vld [vmem:[#allocation9 + $0x8] sm:$0xff]   ;;  %v2907_v49 = vld [vmem:[#allocation4 + $0xb4] ss:$8 sps:$4 sm:$0xff]   ;;  %v2909_v52 = vld [vmem:[#allocation4 + $0xb0] ss:$8 sps:$4 sm:$0xff]  }
  0x75   : > { %2461 = vmatpush3.bf16.msra.mxu0 %v2863_v13  ;;  %2759 = vmatpush3.bf16.msra.mxu1 %v2863_v13  ;;  %v2903_v48 = vld [vmem:[#allocation4 + $0xa0] ss:$8 sps:$4 sm:$0xff]   ;;  %v2919_v51 = vld [vmem:[#allocation9 + $0x18] sm:$0xff]   ;;  %v2922_v55 = vld [vmem:[#allocation9 + $0x30] sm:$0xff]  }
  0x76   : > { %2462 = vmatprep.subr.bf16.mxu0 %v2864_v14  ;;  %2752 = vmatprep.subr.bf16.mxu1 %v2864_v14  ;;  %v2920_v53 = vld [vmem:[#allocation9 + $0x20] sm:$0xff]   ;;  %v2921_v54 = vld [vmem:[#allocation9 + $0x28] sm:$0xff]   ;;  %v2923_v56 = vld [vmem:[#allocation9 + $0x38] sm:$0xff]  }
  0x77   : > { %v328_v58 = vld [vmem:[#allocation3] sm:$0xff]  ;;  %v329_v1 = vld [vmem:[#allocation3 + $0x8] sm:$0xff] }
  0x78   : > { %v352_v63 = vld [vmem:[#allocation3 + $0xc0] sm:$0xff]  ;;  %v353_v8 = vld [vmem:[#allocation3 + $0xc8] sm:$0xff] }
  0x79   : > { %2463 = vmatpush3.bf16.msra.mxu0 %v2865_v15  ;;  %2760 = vmatpush3.bf16.msra.mxu1 %v2865_v15  ;;  %v3413_v3 = vld [vmem:[%s3858_s2] ss:$0 sm:$0xff] }
  0x7a   : > { %2464 = vmatprep.subr.bf16.mxu0 %v2866_v16  ;;  %2753 = vmatprep.subr.bf16.mxu1 %v2866_v16 }
  0x7d   : > { %2465 = vmatpush3.bf16.msra.mxu0 %v2867_v17  ;;  %2761 = vmatpush3.bf16.msra.mxu1 %v2867_v17 }
  0x7e   : > { %2698 = vmatprep.subr.bf16.mxu1 %v2916_v27 }
  0x80   : > { %717 = vmatmul.mubr.bf16.vlgmr.msra.gmra.mrb[0].mxu0 %v2868_v18  ;;  %813 = vmatmul.mubr.bf16.vlgmr.msra.gmra.mrb[0].mxu1 %v2898_v21  ;;  %v330_v18 = vld [vmem:[#allocation3 + $0x10] sm:$0xff] }
  0x81   : > { %724 = vmatprep.mubr.bf16.mxu0 %v2871_v20  ;;  %820 = vmatprep.mubr.bf16.mxu1 %v2904_v22 }
  0x82   : > { %2699 = vmatpush3.bf16.msra.mxu1 %v2916_v27  ;;  %v354_v27 = vld [vmem:[#allocation3 + $0xd0] sm:$0xff] }
  0x83   : > { %2700 = vmatprep.subr.bf16.mxu1 %v2917_v47 }
  0x86   : > { %2701 = vmatpush3.bf16.msra.mxu1 %v2917_v47 }
  0x87   : > { %2702 = vmatprep.subr.bf16.mxu1 %v2918_v50 }
  0x88   : > { %725 = vmatmul.mubr.bf16.gmra.mrb[4].mxu0 %v2873_v23  ;;  %821 = vmatmul.mubr.bf16.gmra.mrb[4].mxu1 %v2906_v25 }
  0x89   : > { %732 = vmatprep.mubr.bf16.mxu0 %v2874_v24  ;;  %828 = vmatprep.mubr.bf16.mxu1 %v2910_v26 }
  0x8a   : > { %2703 = vmatpush3.bf16.msra.mxu1 %v2918_v50 }
  0x8b   : > { %2704 = vmatprep.subr.bf16.mxu1 %v2919_v51 }
  0x8e   : > { %2705 = vmatpush3.bf16.msra.mxu1 %v2919_v51 }
  0x8f   : > { %2706 = vmatprep.subr.bf16.mxu1 %v2920_v53 }
  0x90   : > { %733 = vmatmul.mubr.bf16.gmra.mrb[8].mxu0 %v2876_v28  ;;  %829 = vmatmul.mubr.bf16.gmra.mrb[8].mxu1 %v2912_v30 }
  0x91   : > { %740 = vmatprep.mubr.bf16.mxu0 %v2877_v29  ;;  %836 = vmatprep.mubr.bf16.mxu1 %v2913_v31  ;;  %v331_v29 = vld [vmem:[#allocation3 + $0x18] sm:$0xff] }
  0x92   : > { %2707 = vmatpush3.bf16.msra.mxu1 %v2920_v53 }
  0x93   : > { %2708 = vmatprep.subr.bf16.mxu1 %v2921_v54 }
  0x96   : > { %2709 = vmatpush3.bf16.msra.mxu1 %v2921_v54 }
  0x97   : > { %2710 = vmatprep.subr.bf16.mxu1 %v2922_v55 }
  0x98   : > { %741 = vmatmul.mubr.bf16.gmra.mrb[12].mxu0 %v2879_v32  ;;  %837 = vmatmul.mubr.bf16.gmra.mrb[12].mxu1 %v2915_v34 }
  0x99   : > { %748 = vmatprep.mubr.bf16.mxu0 %v2880_v33 }
  0x9a   : > { %2711 = vmatpush3.bf16.msra.mxu1 %v2922_v55 }
  0x9b   : > { %2712 = vmatprep.subr.bf16.mxu1 %v2923_v56 }
  0x9e   : > { %2713 = vmatpush3.bf16.msra.mxu1 %v2923_v56 }
  0xa0   : > { %749 = vmatmul.mubr.bf16.gmra.mrb[16].mxu0 %v2882_v35 }
  0xa1   : > { %756 = vmatprep.mubr.bf16.mxu0 %v2883_v36 }
  0xa8   : > { %757 = vmatmul.mubr.bf16.gmra.mrb[20].mxu0 %v2885_v37  ;;  %v355_v37 = vld [vmem:[#allocation3 + $0xd8] sm:$0xff] }
  0xa9   : > { %764 = vmatprep.mubr.bf16.mxu0 %v2886_v38 }
  0xb0   : > { %765 = vmatmul.mubr.bf16.gmra.mrb[24].mxu0 %v2888_v39 }
  0xb1   : > { %772 = vmatprep.mubr.bf16.mxu0 %v2889_v40 }
  0xb8   : > { %773 = vmatmul.mubr.bf16.gmra.mrb[28].mxu0 %v2891_v41 }
  0xb9   : > { %780 = vmatprep.mubr.bf16.mxu0 %v2892_v42 }
  0xc0   : > { %781 = vmatmul.mubr.bf16.gmra.mrb[32].mxu0 %v2894_v43 }
  0xc1   : > { %788 = vmatprep.mubr.bf16.mxu0 %v2895_v44 }
  0xc8   : > { %789 = vmatmul.mubr.bf16.gmra.mrb[36].mxu0 %v2897_v45 }
  0xc9   : > { %796 = vmatprep.mubr.bf16.mxu0 %v2901_v46 }
  0xd0   : > { %797 = vmatmul.mubr.bf16.gmra.mrb[40].mxu0 %v2903_v48  ;;  %v332_v48 = vld [vmem:[#allocation3 + $0x20] sm:$0xff] }
  0xd1   : > { %804 = vmatprep.mubr.bf16.mxu0 %v2907_v49 }
  0xd8   : > { %805 = vmatmul.mubr.bf16.gmra.mrb[44].mxu0 %v2909_v52 }
 0x153   : > { %v2466_v57 = vpop.f32.mrb[0].mxu0  ;;  %v2538_v60 = vpop.f32.mrb[0].mxu1 }
 0x154   : > { %v2467_v59 = vpop.f32.mrb[1].mxu0  ;;  %v2539_v0 = vpop.f32.mrb[1].mxu1 }
 0x155   : > { %v2468_v61 = vadd.f32 %v2467_v59, %v2466_v57  ;;  %v2469_v62 = vpop.f32.mrb[2].mxu0  ;;  %v2540_v4 = vadd.f32 %v2539_v0, %v2538_v60  ;;  %v2541_v5 = vpop.f32.mrb[2].mxu1  ;;  %v356_v57 = vld [vmem:[#allocation3 + $0xe0] sm:$0xff]  ;;  %v333_v59 = vld [vmem:[#allocation3 + $0x28] sm:$0xff] }
 0x156   : > { %v2470_v2 = vpop.f32.mrb[3].mxu0  ;;  %v2542_v9 = vpop.f32.mrb[3].mxu1 }
 0x157   : > { %v845_v6 = vadd.f32 %v2468_v61, %v328_v58  ;;  %v2471_v7 = vadd.f32 %v2470_v2, %v2469_v62  ;;  %v869_v10 = vadd.f32 %v2540_v4, %v352_v63  ;;  %v2543_v11 = vadd.f32 %v2542_v9, %v2541_v5  ;;  %v357_v4 = vld [vmem:[#allocation3 + $0xe8] sm:$0xff] }
 0x159   : > { %877 = vst [vmem:[#allocation3] sm:$0xff] %v845_v6  ;;  %v846_v12 = vadd.f32 %v2471_v7, %v329_v1  ;;  %v951_v13 = vadd.f32 %v3413_v3, %v845_v6  ;;  %901 = vst [vmem:[#allocation3 + $0xc0] sm:$0xff] %v869_v10  ;;  %v870_v14 = vadd.f32 %v2543_v11, %v353_v8 }
 0x15a   : > { %v975_v15 = vadd.f32 %v3413_v3, %v869_v10 }
 0x15b   : > { %878 = vst [vmem:[#allocation3 + $0x8] sm:$0xff] %v846_v12  ;;  %v2472_v16 = vpop.f32.mrb[4].mxu0  ;;  %v952_v17 = vadd.f32 %v3413_v3, %v846_v12  ;;  %902 = vst [vmem:[#allocation3 + $0xc8] sm:$0xff] %v870_v14  ;;  %v2544_v20 = vpop.f32.mrb[4].mxu1  ;;  %v976_v21 = vadd.f32 %v3413_v3, %v870_v14  ;;  %v983_v25 = vmax.f32 %v951_v13, 0.0 }
 0x15c   : > { %v2473_v19 = vpop.f32.mrb[5].mxu0  ;;  %v1007_v22 = vmax.f32 %v975_v15, 0.0  ;;  %v2545_v28 = vpop.f32.mrb[5].mxu1  ;;  %v334_v15 = vld [vmem:[#allocation3 + $0x30] sm:$0xff] }
 0x15d   : > { %v2474_v23 = vadd.f32 %v2473_v19, %v2472_v16  ;;  %v2475_v24 = vpop.f32.mrb[6].mxu0  ;;  %v984_v26 = vmax.f32 %v952_v17, 0.0  ;;  %v2546_v31 = vadd.f32 %v2545_v28, %v2544_v20  ;;  %v2547_v32 = vpop.f32.mrb[6].mxu1  ;;  %v1008_v33 = vmax.f32 %v976_v21, 0.0 }
 0x15e   : > { %v2476_v30 = vpop.f32.mrb[7].mxu0  ;;  %v2548_v38 = vpop.f32.mrb[7].mxu1 }
 0x15f   : > { %v847_v34 = vadd.f32 %v2474_v23, %v330_v18  ;;  %v2477_v35 = vadd.f32 %v2476_v30, %v2475_v24  ;;  %v1015_v36 = vpack.c.bf16 %v984_v26, %v983_v25  ;;  %v871_v39 = vadd.f32 %v2546_v31, %v354_v27  ;;  %v358_v24 = vld [vmem:[#allocation3 + $0xf0] sm:$0xff]  ;;  %v335_v26 = vld [vmem:[#allocation3 + $0x38] sm:$0xff] }
 0x160   : > { %v2549_v40 = vadd.f32 %v2548_v38, %v2547_v32  ;;  %v3419_v41 = vpack.c.bf16 %v1008_v33, %v1007_v22 }
 0x161   : > { %879 = vst [vmem:[#allocation3 + $0x10] sm:$0xff] %v847_v34  ;;  %v848_v42 = vadd.f32 %v2477_v35, %v331_v29  ;;  %2714 = vmatprep.mubr.bf16.mxu1 %v1015_v36  ;;  %v953_v43 = vadd.f32 %v3413_v3, %v847_v34  ;;  %903 = vst [vmem:[#allocation3 + $0xd0] sm:$0xff] %v871_v39  ;;  %v977_v45 = vadd.f32 %v3413_v3, %v871_v39  ;;  %v359_v34 = vld [vmem:[#allocation3 + $0xf8] sm:$0xff] }
 0x162   : > { %v872_v44 = vadd.f32 %v2549_v40, %v355_v37 }
 0x163   : > { %880 = vst [vmem:[#allocation3 + $0x18] sm:$0xff] %v848_v42  ;;  %v2478_v46 = vpop.f32.mrb[8].mxu0  ;;  %v954_v47 = vadd.f32 %v3413_v3, %v848_v42  ;;  %v2550_v50 = vpop.f32.mrb[8].mxu1  ;;  %v1009_v52 = vmax.f32 %v977_v45, 0.0  ;;  %v985_v55 = vmax.f32 %v953_v43, 0.0 }
 0x164   : > { %v2479_v49 = vpop.f32.mrb[9].mxu0  ;;  %904 = vst [vmem:[#allocation3 + $0xd8] sm:$0xff] %v872_v44  ;;  %v978_v51 = vadd.f32 %v3413_v3, %v872_v44  ;;  %v2551_v58 = vpop.f32.mrb[9].mxu1 }
 0x165   : > { %v2480_v53 = vadd.f32 %v2479_v49, %v2478_v46  ;;  %v2481_v54 = vpop.f32.mrb[10].mxu0  ;;  %v986_v56 = vmax.f32 %v954_v47, 0.0  ;;  %v2552_v61 = vadd.f32 %v2551_v58, %v2550_v50  ;;  %v2553_v62 = vpop.f32.mrb[10].mxu1  ;;  %v336_v46 = vld [vmem:[#allocation3 + $0x40] sm:$0xff] }
 0x166   : > { %v2482_v60 = vpop.f32.mrb[11].mxu0  ;;  %v1010_v63 = vmax.f32 %v978_v51, 0.0  ;;  %v2554_v5 = vpop.f32.mrb[11].mxu1 }
 0x167   : > { %v849_v0 = vadd.f32 %v2480_v53, %v332_v48  ;;  %v2483_v1 = vadd.f32 %v2482_v60, %v2481_v54  ;;  %v1016_v2 = vpack.c.bf16 %v986_v56, %v985_v55  ;;  %v873_v6 = vadd.f32 %v2552_v61, %v356_v57  ;;  %v337_v54 = vld [vmem:[#allocation3 + $0x48] sm:$0xff] }
 0x168   : > { %v2555_v7 = vadd.f32 %v2554_v5, %v2553_v62  ;;  %v3425_v8 = vpack.c.bf16 %v1010_v63, %v1009_v52 }
 0x169   : > { %881 = vst [vmem:[#allocation3 + $0x20] sm:$0xff] %v849_v0  ;;  %v850_v9 = vadd.f32 %v2483_v1, %v333_v59  ;;  %2715 = vmatmul.mubr.bf16.vlgmr.msra.gmra.mrb[16].mxu1 %v1016_v2  ;;  %v955_v10 = vadd.f32 %v3413_v3, %v849_v0  ;;  %905 = vst [vmem:[#allocation3 + $0xe0] sm:$0xff] %v873_v6  ;;  %v979_v12 = vadd.f32 %v3413_v3, %v873_v6  ;;  %v338_v1 = vld [vmem:[#allocation3 + $0x50] sm:$0xff] }
 0x16a   : > { %v874_v11 = vadd.f32 %v2555_v7, %v357_v4 }
 0x16b   : > { %882 = vst [vmem:[#allocation3 + $0x28] sm:$0xff] %v850_v9  ;;  %v2484_v13 = vpop.f32.mrb[12].mxu0  ;;  %v956_v14 = vadd.f32 %v3413_v3, %v850_v9  ;;  %v2556_v17 = vpop.f32.mrb[12].mxu1  ;;  %v1011_v19 = vmax.f32 %v979_v12, 0.0  ;;  %v987_v22 = vmax.f32 %v955_v10, 0.0  ;;  %v339_v9 = vld [vmem:[#allocation3 + $0x58] sm:$0xff] }
 0x16c   : > { %v2485_v16 = vpop.f32.mrb[13].mxu0  ;;  %906 = vst [vmem:[#allocation3 + $0xe8] sm:$0xff] %v874_v11  ;;  %v980_v18 = vadd.f32 %v3413_v3, %v874_v11  ;;  %v2557_v25 = vpop.f32.mrb[13].mxu1 }
 0x16d   : > { %v2486_v20 = vadd.f32 %v2485_v16, %v2484_v13  ;;  %v2487_v21 = vpop.f32.mrb[14].mxu0  ;;  %v988_v23 = vmax.f32 %v956_v14, 0.0  ;;  %v2558_v28 = vadd.f32 %v2557_v25, %v2556_v17  ;;  %v2559_v29 = vpop.f32.mrb[14].mxu1 }
 0x16e   : > { %v2488_v27 = vpop.f32.mrb[15].mxu0  ;;  %v1012_v30 = vmax.f32 %v980_v18, 0.0  ;;  %v2560_v35 = vpop.f32.mrb[15].mxu1  ;;  %v340_v18 = vld [vmem:[#allocation3 + $0x60] sm:$0xff] }
 0x16f   : > { %v851_v31 = vadd.f32 %v2486_v20, %v334_v15  ;;  %v2489_v32 = vadd.f32 %v2488_v27, %v2487_v21  ;;  %v1017_v33 = vpack.c.bf16 %v988_v23, %v987_v22  ;;  %v875_v36 = vadd.f32 %v2558_v28, %v358_v24  ;;  %v341_v24 = vld [vmem:[#allocation3 + $0x68] sm:$0xff] }
 0x170   : > { %v2561_v37 = vadd.f32 %v2560_v35, %v2559_v29  ;;  %v3431_v38 = vpack.c.bf16 %v1012_v30, %v1011_v19 }
 0x171   : > { %883 = vst [vmem:[#allocation3 + $0x30] sm:$0xff] %v851_v31  ;;  %v852_v39 = vadd.f32 %v2489_v32, %v335_v26  ;;  %2718 = vmatprep.mubr.bf16.mxu1 %v1017_v33  ;;  %v957_v40 = vadd.f32 %v3413_v3, %v851_v31  ;;  %907 = vst [vmem:[#allocation3 + $0xf0] sm:$0xff] %v875_v36  ;;  %v981_v43 = vadd.f32 %v3413_v3, %v875_v36  ;;  %v342_v33 = vld [vmem:[#allocation3 + $0x70] sm:$0xff] }
 0x172   : > { %v876_v42 = vadd.f32 %v2561_v37, %v359_v34 }
 0x173   : > { %884 = vst [vmem:[#allocation3 + $0x38] sm:$0xff] %v852_v39  ;;  %v2490_v44 = vpop.f32.mrb[16].mxu0  ;;  %v958_v45 = vadd.f32 %v3413_v3, %v852_v39  ;;  %v1013_v49 = vmax.f32 %v981_v43, 0.0  ;;  %v989_v52 = vmax.f32 %v957_v40, 0.0  ;;  %v343_v40 = vld [vmem:[#allocation3 + $0x78] sm:$0xff] }
 0x174   : > { %v2491_v47 = vpop.f32.mrb[17].mxu0  ;;  %908 = vst [vmem:[#allocation3 + $0xf8] sm:$0xff] %v876_v42  ;;  %v982_v48 = vadd.f32 %v3413_v3, %v876_v42 }
 0x175   : > { %v2492_v50 = vadd.f32 %v2491_v47, %v2490_v44  ;;  %v2493_v51 = vpop.f32.mrb[18].mxu0  ;;  %v990_v53 = vmax.f32 %v958_v45, 0.0 }
 0x176   : > { %v2494_v55 = vpop.f32.mrb[19].mxu0  ;;  %v1014_v56 = vmax.f32 %v982_v48, 0.0 }
 0x177   : > { %v853_v57 = vadd.f32 %v2492_v50, %v336_v46  ;;  %v2495_v58 = vadd.f32 %v2494_v55, %v2493_v51  ;;  %v1018_v59 = vpack.c.bf16 %v990_v53, %v989_v52  ;;  %v344_v50 = vld [vmem:[#allocation3 + $0x80] sm:$0xff] }
 0x178   : > { %v3437_v60 = vpack.c.bf16 %v1014_v56, %v1013_v49  ;;  %v345_v56 = vld [vmem:[#allocation3 + $0x88] sm:$0xff] }
 0x179   : > { %885 = vst [vmem:[#allocation3 + $0x40] sm:$0xff] %v853_v57  ;;  %v854_v61 = vadd.f32 %v2495_v58, %v337_v54  ;;  %2719 = vmatmul.mubr.bf16.gmra.mrb[20].mxu1 %v1018_v59  ;;  %v959_v62 = vadd.f32 %v3413_v3, %v853_v57 }
 0x17b   : > { %886 = vst [vmem:[#allocation3 + $0x48] sm:$0xff] %v854_v61  ;;  %v2496_v63 = vpop.f32.mrb[20].mxu0  ;;  %v960_v0 = vadd.f32 %v3413_v3, %v854_v61  ;;  %v991_v6 = vmax.f32 %v959_v62, 0.0 }
 0x17c   : > { %v2497_v2 = vpop.f32.mrb[21].mxu0 }
 0x17d   : > { %v2498_v4 = vadd.f32 %v2497_v2, %v2496_v63  ;;  %v2499_v5 = vpop.f32.mrb[22].mxu0  ;;  %v992_v7 = vmax.f32 %v960_v0, 0.0  ;;  %v346_v2 = vld [vmem:[#allocation3 + $0x90] sm:$0xff] }
 0x17e   : > { %v2500_v10 = vpop.f32.mrb[23].mxu0 }
 0x17f   : > { %v855_v11 = vadd.f32 %v2498_v4, %v338_v1  ;;  %v2501_v12 = vadd.f32 %v2500_v10, %v2499_v5  ;;  %v1019_v13 = vpack.c.bf16 %v992_v7, %v991_v6  ;;  %v347_v10 = vld [vmem:[#allocation3 + $0x98] sm:$0xff] }
 0x181   : > { %887 = vst [vmem:[#allocation3 + $0x50] sm:$0xff] %v855_v11  ;;  %v856_v14 = vadd.f32 %v2501_v12, %v339_v9  ;;  %2722 = vmatprep.mubr.bf16.mxu1 %v1019_v13  ;;  %v961_v15 = vadd.f32 %v3413_v3, %v855_v11 }
 0x183   : > { %888 = vst [vmem:[#allocation3 + $0x58] sm:$0xff] %v856_v14  ;;  %v2502_v16 = vpop.f32.mrb[24].mxu0  ;;  %v962_v17 = vadd.f32 %v3413_v3, %v856_v14  ;;  %v993_v22 = vmax.f32 %v961_v15, 0.0 }
 0x184   : > { %v2503_v19 = vpop.f32.mrb[25].mxu0 }
 0x185   : > { %v2504_v20 = vadd.f32 %v2503_v19, %v2502_v16  ;;  %v2505_v21 = vpop.f32.mrb[26].mxu0  ;;  %v994_v23 = vmax.f32 %v962_v17, 0.0  ;;  %v348_v19 = vld [vmem:[#allocation3 + $0xa0] sm:$0xff] }
 0x186   : > { %v2506_v25 = vpop.f32.mrb[27].mxu0 }
 0x187   : > { %v857_v26 = vadd.f32 %v2504_v20, %v340_v18  ;;  %v2507_v27 = vadd.f32 %v2506_v25, %v2505_v21  ;;  %v1020_v28 = vpack.c.bf16 %v994_v23, %v993_v22  ;;  %v349_v25 = vld [vmem:[#allocation3 + $0xa8] sm:$0xff] }
 0x189   : > { %889 = vst [vmem:[#allocation3 + $0x60] sm:$0xff] %v857_v26  ;;  %v858_v29 = vadd.f32 %v2507_v27, %v341_v24  ;;  %2723 = vmatmul.mubr.bf16.gmra.mrb[24].mxu1 %v1020_v28  ;;  %v963_v30 = vadd.f32 %v3413_v3, %v857_v26 }
 0x18b   : > { %890 = vst [vmem:[#allocation3 + $0x68] sm:$0xff] %v858_v29  ;;  %v2508_v31 = vpop.f32.mrb[28].mxu0  ;;  %v964_v32 = vadd.f32 %v3413_v3, %v858_v29  ;;  %v995_v37 = vmax.f32 %v963_v30, 0.0 }
 0x18c   : > { %v2509_v34 = vpop.f32.mrb[29].mxu0 }
 0x18d   : > { %v2510_v35 = vadd.f32 %v2509_v34, %v2508_v31  ;;  %v2511_v36 = vpop.f32.mrb[30].mxu0  ;;  %v996_v39 = vmax.f32 %v964_v32, 0.0  ;;  %v350_v34 = vld [vmem:[#allocation3 + $0xb0] sm:$0xff] }
 0x18e   : > { %v2512_v42 = vpop.f32.mrb[31].mxu0 }
 0x18f   : > { %v859_v43 = vadd.f32 %v2510_v35, %v342_v33  ;;  %v2513_v44 = vadd.f32 %v2512_v42, %v2511_v36  ;;  %v1021_v45 = vpack.c.bf16 %v996_v39, %v995_v37  ;;  %v351_v42 = vld [vmem:[#allocation3 + $0xb8] sm:$0xff] }
 0x191   : > { %891 = vst [vmem:[#allocation3 + $0x70] sm:$0xff] %v859_v43  ;;  %v860_v46 = vadd.f32 %v2513_v44, %v343_v40  ;;  %2726 = vmatprep.mubr.bf16.mxu1 %v1021_v45  ;;  %v965_v47 = vadd.f32 %v3413_v3, %v859_v43 }
 0x193   : > { %892 = vst [vmem:[#allocation3 + $0x78] sm:$0xff] %v860_v46  ;;  %v2514_v48 = vpop.f32.mrb[32].mxu0  ;;  %v966_v49 = vadd.f32 %v3413_v3, %v860_v46  ;;  %v997_v54 = vmax.f32 %v965_v47, 0.0 }
 0x194   : > { %v2515_v51 = vpop.f32.mrb[33].mxu0 }
 0x195   : > { %v2516_v52 = vadd.f32 %v2515_v51, %v2514_v48  ;;  %v2517_v53 = vpop.f32.mrb[34].mxu0  ;;  %v998_v55 = vmax.f32 %v966_v49, 0.0 }
 0x196   : > { %v2518_v57 = vpop.f32.mrb[35].mxu0 }
 0x197   : > { %v861_v58 = vadd.f32 %v2516_v52, %v344_v50  ;;  %v2519_v59 = vadd.f32 %v2518_v57, %v2517_v53  ;;  %v1022_v61 = vpack.c.bf16 %v998_v55, %v997_v54 }
 0x199   : > { %893 = vst [vmem:[#allocation3 + $0x80] sm:$0xff] %v861_v58  ;;  %v862_v62 = vadd.f32 %v2519_v59, %v345_v56  ;;  %2727 = vmatmul.mubr.bf16.gmra.mrb[28].mxu1 %v1022_v61  ;;  %v967_v63 = vadd.f32 %v3413_v3, %v861_v58 }
 0x19b   : > { %894 = vst [vmem:[#allocation3 + $0x88] sm:$0xff] %v862_v62  ;;  %v2520_v0 = vpop.f32.mrb[36].mxu0  ;;  %v968_v1 = vadd.f32 %v3413_v3, %v862_v62  ;;  %v999_v7 = vmax.f32 %v967_v63, 0.0 }
 0x19c   : > { %v2521_v4 = vpop.f32.mrb[37].mxu0 }
 0x19d   : > { %v2522_v5 = vadd.f32 %v2521_v4, %v2520_v0  ;;  %v2523_v6 = vpop.f32.mrb[38].mxu0  ;;  %v1000_v9 = vmax.f32 %v968_v1, 0.0 }
 0x19e   : > { %v2524_v11 = vpop.f32.mrb[39].mxu0 }
 0x19f   : > { %v863_v12 = vadd.f32 %v2522_v5, %v346_v2  ;;  %v2525_v13 = vadd.f32 %v2524_v11, %v2523_v6  ;;  %v1023_v14 = vpack.c.bf16 %v1000_v9, %v999_v7 }
 0x1a1   : > { %895 = vst [vmem:[#allocation3 + $0x90] sm:$0xff] %v863_v12  ;;  %v864_v15 = vadd.f32 %v2525_v13, %v347_v10  ;;  %2730 = vmatprep.mubr.bf16.mxu1 %v1023_v14  ;;  %v969_v16 = vadd.f32 %v3413_v3, %v863_v12 }
 0x1a3   : > { %896 = vst [vmem:[#allocation3 + $0x98] sm:$0xff] %v864_v15  ;;  %v2526_v17 = vpop.f32.mrb[40].mxu0  ;;  %v970_v18 = vadd.f32 %v3413_v3, %v864_v15  ;;  %v1001_v23 = vmax.f32 %v969_v16, 0.0 }
 0x1a4   : > { %v2527_v20 = vpop.f32.mrb[41].mxu0 }
 0x1a5   : > { %v2528_v21 = vadd.f32 %v2527_v20, %v2526_v17  ;;  %v2529_v22 = vpop.f32.mrb[42].mxu0  ;;  %v1002_v24 = vmax.f32 %v970_v18, 0.0 }
 0x1a6   : > { %v2530_v26 = vpop.f32.mrb[43].mxu0 }
 0x1a7   : > { %v865_v27 = vadd.f32 %v2528_v21, %v348_v19  ;;  %v2531_v28 = vadd.f32 %v2530_v26, %v2529_v22  ;;  %v1024_v29 = vpack.c.bf16 %v1002_v24, %v1001_v23 }
 0x1a9   : > { %897 = vst [vmem:[#allocation3 + $0xa0] sm:$0xff] %v865_v27  ;;  %v866_v30 = vadd.f32 %v2531_v28, %v349_v25  ;;  %2731 = vmatmul.mubr.bf16.gmra.mrb[32].mxu1 %v1024_v29  ;;  %v971_v31 = vadd.f32 %v3413_v3, %v865_v27 }
 0x1ab   : > { %898 = vst [vmem:[#allocation3 + $0xa8] sm:$0xff] %v866_v30  ;;  %v2532_v32 = vpop.f32.mrb[44].mxu0  ;;  %v972_v33 = vadd.f32 %v3413_v3, %v866_v30  ;;  %v1003_v39 = vmax.f32 %v971_v31, 0.0 }
 0x1ac   : > { %v2533_v35 = vpop.f32.mrb[45].mxu0 }
 0x1ad   : > { %v2534_v36 = vadd.f32 %v2533_v35, %v2532_v32  ;;  %v2535_v37 = vpop.f32.mrb[46].mxu0  ;;  %v1004_v40 = vmax.f32 %v972_v33, 0.0 }
 0x1ae   : > { %v2536_v43 = vpop.f32.mrb[47].mxu0 }
 0x1af   : > { %v867_v44 = vadd.f32 %v2534_v36, %v350_v34  ;;  %v2537_v45 = vadd.f32 %v2536_v43, %v2535_v37  ;;  %v1025_v46 = vpack.c.bf16 %v1004_v40, %v1003_v39 }
 0x1b1   : > { %899 = vst [vmem:[#allocation3 + $0xb0] sm:$0xff] %v867_v44  ;;  %v868_v47 = vadd.f32 %v2537_v45, %v351_v42  ;;  %2734 = vmatprep.mubr.bf16.mxu1 %v1025_v46  ;;  %v973_v48 = vadd.f32 %v3413_v3, %v867_v44 }
 0x1b3   : > { %900 = vst [vmem:[#allocation3 + $0xb8] sm:$0xff] %v868_v47  ;;  %v974_v49 = vadd.f32 %v3413_v3, %v868_v47  ;;  %v1005_v50 = vmax.f32 %v973_v48, 0.0 }
 0x1b5   : > { %v1006_v51 = vmax.f32 %v974_v49, 0.0 }
 0x1b7   : > { %v1026_v52 = vpack.c.bf16 %v1006_v51, %v1005_v50 }
 0x1b9   : > { %2735 = vmatmul.mubr.bf16.gmra.mrb[36].mxu1 %v1026_v52 }
 0x1ba   : > { %2738 = vmatprep.mubr.bf16.mxu1 %v3419_v41 }
 0x1c1   : > { %2739 = vmatmul.mubr.bf16.gmra.mrb[40].mxu1 %v3425_v8 }
 0x1c2   : > { %2742 = vmatprep.mubr.bf16.mxu1 %v3431_v38 }
 0x1c9   : > { %2743 = vmatmul.mubr.bf16.gmra.mrb[44].mxu1 %v3437_v60 }
 0x23c   : > { %v2716_v53 = vpop.f32.mrb[16].mxu1 }
 0x23d   : > { %v1129_v54 = vpop.f32.mrb[17].mxu1 }
 0x23e   : > { %v2717_v55 = vpop.f32.mrb[18].mxu1 }
 0x23f   : > { %v1257_v56 = vpack.c.bf16 %v2717_v55, %v2716_v53  ;;  %v1132_v57 = vpop.f32.mrb[19].mxu1 }
 0x240   : > { %v1256_v58 = vpack.c.bf16 %v1132_v57, %v1129_v54 }
 0x241   : > { %1277 = vst [vmem:[#allocation2 + $0x8] sm:$0xff] %v1257_v56 }
 0x242   : > { %1276 = vst [vmem:[#allocation2] sm:$0xff] %v1256_v58 }
 0x24c   : > { %v2720_v3 = vpop.f32.mrb[20].mxu1 }
 0x24d   : > { %v1145_v59 = vpop.f32.mrb[21].mxu1 }
 0x24e   : > { %v2721_v61 = vpop.f32.mrb[22].mxu1 }
 0x24f   : > { %v1259_v62 = vpack.c.bf16 %v2721_v61, %v2720_v3  ;;  %v1148_v63 = vpop.f32.mrb[23].mxu1 }
 0x250   : > { %v1258_v41 = vpack.c.bf16 %v1148_v63, %v1145_v59 }
 0x251   : > { %1279 = vst [vmem:[#allocation2 + $0x18] sm:$0xff] %v1259_v62 }
 0x252   : > { %1278 = vst [vmem:[#allocation2 + $0x10] sm:$0xff] %v1258_v41 }
 0x25c   : > { %v2724_v8 = vpop.f32.mrb[24].mxu1 }
 0x25d   : > { %v1161_v38 = vpop.f32.mrb[25].mxu1 }
 0x25e   : > { %v2725_v0 = vpop.f32.mrb[26].mxu1 }
 0x25f   : > { %v1261_v60 = vpack.c.bf16 %v2725_v0, %v2724_v8  ;;  %v1164_v1 = vpop.f32.mrb[27].mxu1 }
 0x260   : > { %v1260_v2 = vpack.c.bf16 %v1164_v1, %v1161_v38 }
 0x261   : > { %1281 = vst [vmem:[#allocation2 + $0x28] sm:$0xff] %v1261_v60 }
 0x262   : > { %1280 = vst [vmem:[#allocation2 + $0x20] sm:$0xff] %v1260_v2 }
 0x26c   : > { %v2728_v4 = vpop.f32.mrb[28].mxu1 }
 0x26d   : > { %v1177_v5 = vpop.f32.mrb[29].mxu1 }
 0x26e   : > { %v2729_v6 = vpop.f32.mrb[30].mxu1 }
 0x26f   : > { %v1263_v7 = vpack.c.bf16 %v2729_v6, %v2728_v4  ;;  %v1180_v9 = vpop.f32.mrb[31].mxu1 }
 0x270   : > { %v1262_v10 = vpack.c.bf16 %v1180_v9, %v1177_v5 }
 0x271   : > { %1283 = vst [vmem:[#allocation2 + $0x38] sm:$0xff] %v1263_v7 }
 0x272   : > { %1282 = vst [vmem:[#allocation2 + $0x30] sm:$0xff] %v1262_v10 }
 0x27c   : > { %v2732_v11 = vpop.f32.mrb[32].mxu1 }
 0x27d   : > { %v1193_v12 = vpop.f32.mrb[33].mxu1 }
 0x27e   : > { %v2733_v13 = vpop.f32.mrb[34].mxu1 }
 0x27f   : > { %v1265_v14 = vpack.c.bf16 %v2733_v13, %v2732_v11  ;;  %v1196_v15 = vpop.f32.mrb[35].mxu1 }
 0x280   : > { %v1264_v16 = vpack.c.bf16 %v1196_v15, %v1193_v12 }
 0x281   : > { %1285 = vst [vmem:[#allocation2 + $0x48] sm:$0xff] %v1265_v14 }
 0x282   : > { %1284 = vst [vmem:[#allocation2 + $0x40] sm:$0xff] %v1264_v16 }
 0x28c   : > { %v2736_v17 = vpop.f32.mrb[36].mxu1 }
 0x28d   : > { %v1209_v18 = vpop.f32.mrb[37].mxu1 }
 0x28e   : > { %v2737_v19 = vpop.f32.mrb[38].mxu1 }
 0x28f   : > { %v1267_v20 = vpack.c.bf16 %v2737_v19, %v2736_v17  ;;  %v1212_v21 = vpop.f32.mrb[39].mxu1 }
 0x290   : > { %v1266_v22 = vpack.c.bf16 %v1212_v21, %v1209_v18 }
 0x291   : > { %1287 = vst [vmem:[#allocation2 + $0x58] sm:$0xff] %v1267_v20 }
 0x292   : > { %1286 = vst [vmem:[#allocation2 + $0x50] sm:$0xff] %v1266_v22 }
 0x294   : > { %v2740_v23 = vpop.f32.mrb[40].mxu1 }
 0x295   : > { %v1225_v24 = vpop.f32.mrb[41].mxu1 }
 0x296   : > { %v2741_v25 = vpop.f32.mrb[42].mxu1 }
 0x297   : > { %v1269_v26 = vpack.c.bf16 %v2741_v25, %v2740_v23  ;;  %v1228_v27 = vpop.f32.mrb[43].mxu1 }
 0x298   : > { %v1268_v28 = vpack.c.bf16 %v1228_v27, %v1225_v24 }
 0x299   : > { %1289 = vst [vmem:[#allocation2 + $0x68] sm:$0xff] %v1269_v26 }
 0x29a   : > { %1288 = vst [vmem:[#allocation2 + $0x60] sm:$0xff] %v1268_v28 }
 0x29c   : > { %v2744_v29 = vpop.f32.mrb[44].mxu1 }
 0x29d   : > { %v1241_v30 = vpop.f32.mrb[45].mxu1 }
 0x29e   : > { %v2745_v31 = vpop.f32.mrb[46].mxu1 }
 0x29f   : > { %v1271_v32 = vpack.c.bf16 %v2745_v31, %v2744_v29  ;;  %v1244_v33 = vpop.f32.mrb[47].mxu1 }
 0x2a0   : > { %v1270_v34 = vpack.c.bf16 %v1244_v33, %v1241_v30 }
 0x2a1   : > { %1291 = vst [vmem:[#allocation2 + $0x78] sm:$0xff] %v1271_v32 }
 0x2a2   : > { %1290 = vst [vmem:[#allocation2 + $0x70] sm:$0xff] %v1270_v34 }
 0x2a3 PF: > { %p2412_p3 = scmp.ne.s32.totalorder %s3236_s18, 1 }
 0x2a4   : > { %v1372_v35 = vld [vmem:[#allocation2 + $0x40] sm:$0xff] (!%p2412_p3)  ;;  %v1373_v37 = vld [vmem:[#allocation2 + $0x48] sm:$0xff] (!%p2412_p3)  ;;  %v1374_v40 = vld [vmem:[#allocation2 + $0x50] sm:$0xff] (!%p2412_p3)  ;;  %v1839_v19 = vlaneseq (!%p2412_p3) }
 0x2a5   : > { %1295 = sbr.rel (%p2412_p3) target bundleno = 1313 (0x521), region = 68  ;;  %v1364_v36 = vld [vmem:[#allocation2] sm:$0xff] (!%p2412_p3)  ;;  %2586 = vmatprep.subr.bf16.mxu0 (!%p2412_p3), %v1372_v35  ;;  %2762 = vmatprep.subr.bf16.mxu1 (!%p2412_p3), %v1372_v35  ;;  %v1365_v39 = vld [vmem:[#allocation2 + $0x8] sm:$0xff] (!%p2412_p3)  ;;  %v1366_v43 = vld [vmem:[#allocation2 + $0x10] sm:$0xff] (!%p2412_p3) }
 0x2a6   : > { %2587 = vmatpush3.bf16.msra.mxu0 (!%p2412_p3), %v1364_v36  ;;  %2770 = vmatpush3.bf16.msra.mxu1 (!%p2412_p3), %v1364_v36  ;;  %v2926_v42 = vld [vmem:[#allocation4 + $0x4] ss:$8 sps:$4 sm:$0xff] (!%p2412_p3)   ;;  %v1375_v45 = vld [vmem:[#allocation2 + $0x58] sm:$0xff] (!%p2412_p3)  ;;  %v1370_v52 = vld [vmem:[#allocation2 + $0x30] sm:$0xff] (!%p2412_p3)  ;;  %v3460_v26 = vand.u32 (!%p2412_p3), 127, %v1839_v19 }
 0x2a7   : > { %2588 = vmatprep.subr.bf16.mxu0 (!%p2412_p3), %v1373_v37  ;;  %2763 = vmatprep.subr.bf16.mxu1 (!%p2412_p3), %v1373_v37  ;;  %v2929_v44 = vld [vmem:[#allocation4 + $0x84] ss:$8 sps:$4 sm:$0xff] (!%p2412_p3)   ;;  %v1367_v46 = vld [vmem:[#allocation2 + $0x18] sm:$0xff] (!%p2412_p3)  ;;  %v2924_v55 = vld [vmem:[#allocation4] ss:$8 sps:$4 sm:$0xff] (!%p2412_p3)  }
 0x2a8   : > { %1572 = vmatprep.mubr.bf16.mxu0 (!%p2412_p3), %v2926_v42  ;;  %1636 = vmatprep.mubr.bf16.mxu1 (!%p2412_p3), %v2929_v44  ;;  %v1376_v47 = vld [vmem:[#allocation2 + $0x60] sm:$0xff] (!%p2412_p3)  ;;  %v1377_v49 = vld [vmem:[#allocation2 + $0x68] sm:$0xff] (!%p2412_p3)  ;;  %v1379_v53 = vld [vmem:[#allocation2 + $0x78] sm:$0xff] (!%p2412_p3)  ;;  %vm1841_vm0 = vcmp.lt.s32.totalorder (!%p2412_p3), %v3460_v26, 4 }
 0x2a9   : > { %v1368_v48 = vld [vmem:[#allocation2 + $0x20] sm:$0xff] (!%p2412_p3)  ;;  %v1369_v50 = vld [vmem:[#allocation2 + $0x28] sm:$0xff] (!%p2412_p3)  ;;  %v1378_v51 = vld [vmem:[#allocation2 + $0x70] sm:$0xff] (!%p2412_p3) }
 0x2aa   : > { %2589 = vmatpush3.bf16.msra.mxu0 (!%p2412_p3), %v1365_v39  ;;  %2771 = vmatpush3.bf16.msra.mxu1 (!%p2412_p3), %v1365_v39  ;;  %v1371_v54 = vld [vmem:[#allocation2 + $0x38] sm:$0xff] (!%p2412_p3)  ;;  %v2927_v56 = vld [vmem:[#allocation4 + $0x80] ss:$8 sps:$4 sm:$0xff] (!%p2412_p3)   ;;  %v2936_v61 = vld [vmem:[#allocation4 + $0x24] ss:$8 sps:$4 sm:$0xff] (!%p2412_p3)  }
 0x2ab   : > { %2590 = vmatprep.subr.bf16.mxu0 (!%p2412_p3), %v1374_v40  ;;  %2764 = vmatprep.subr.bf16.mxu1 (!%p2412_p3), %v1374_v40  ;;  %v2930_v57 = vld [vmem:[#allocation4 + $0x14] ss:$8 sps:$4 sm:$0xff] (!%p2412_p3)   ;;  %v2932_v3 = vld [vmem:[#allocation4 + $0x10] ss:$8 sps:$4 sm:$0xff] (!%p2412_p3)   ;;  %v2939_v62 = vld [vmem:[#allocation4 + $0xa4] ss:$8 sps:$4 sm:$0xff] (!%p2412_p3)  }
 0x2ac   : > { %v2933_v58 = vld [vmem:[#allocation4 + $0x94] ss:$8 sps:$4 sm:$0xff]   ;;  %v2935_v59 = vld [vmem:[#allocation4 + $0x90] ss:$8 sps:$4 sm:$0xff]   ;;  %v2938_v63 = vld [vmem:[#allocation4 + $0x20] ss:$8 sps:$4 sm:$0xff]  }
 0x2ad   : > { %v2941_v41 = vld [vmem:[#allocation4 + $0xa0] ss:$8 sps:$4 sm:$0xff]   ;;  %v2942_v8 = vld [vmem:[#allocation4 + $0x34] ss:$8 sps:$4 sm:$0xff]   ;;  %v2944_v0 = vld [vmem:[#allocation4 + $0x30] ss:$8 sps:$4 sm:$0xff]  }
 0x2ae   : > { %2591 = vmatpush3.bf16.msra.mxu0 %v1366_v43  ;;  %2772 = vmatpush3.bf16.msra.mxu1 %v1366_v43  ;;  %v2945_v38 = vld [vmem:[#allocation4 + $0xb4] ss:$8 sps:$4 sm:$0xff]   ;;  %v2947_v60 = vld [vmem:[#allocation4 + $0xb0] ss:$8 sps:$4 sm:$0xff]   ;;  %v2948_v1 = vld [vmem:[#allocation4 + $0x44] ss:$8 sps:$4 sm:$0xff]  }
 0x2af   : > { %2592 = vmatprep.subr.bf16.mxu0 %v1375_v45  ;;  %2765 = vmatprep.subr.bf16.mxu1 %v1375_v45  ;;  %v2951_v2 = vld [vmem:[#allocation4 + $0xc4] ss:$8 sps:$4 sm:$0xff]   ;;  %v2950_v4 = vld [vmem:[#allocation4 + $0x40] ss:$8 sps:$4 sm:$0xff]   ;;  %v2954_v6 = vld [vmem:[#allocation4 + $0x54] ss:$8 sps:$4 sm:$0xff]  }
 0x2b0   : > { %v2953_v5 = vld [vmem:[#allocation4 + $0xc0] ss:$8 sps:$4 sm:$0xff]   ;;  %v2957_v7 = vld [vmem:[#allocation4 + $0xd4] ss:$8 sps:$4 sm:$0xff]   ;;  %v2956_v9 = vld [vmem:[#allocation4 + $0x50] ss:$8 sps:$4 sm:$0xff]  }
 0x2b1   : > { %v2959_v10 = vld [vmem:[#allocation4 + $0xd0] ss:$8 sps:$4 sm:$0xff]   ;;  %v2960_v11 = vld [vmem:[#allocation4 + $0x64] ss:$8 sps:$4 sm:$0xff]   ;;  %v2962_v13 = vld [vmem:[#allocation4 + $0x60] ss:$8 sps:$4 sm:$0xff]  }
 0x2b2   : > { %2593 = vmatpush3.bf16.msra.mxu0 %v1367_v46  ;;  %2773 = vmatpush3.bf16.msra.mxu1 %v1367_v46  ;;  %v2963_v12 = vld [vmem:[#allocation4 + $0xe4] ss:$8 sps:$4 sm:$0xff]   ;;  %v2965_v14 = vld [vmem:[#allocation4 + $0xe0] ss:$8 sps:$4 sm:$0xff]   ;;  %v2966_v15 = vld [vmem:[#allocation4 + $0x74] ss:$8 sps:$4 sm:$0xff]  }
 0x2b3   : > { %2594 = vmatprep.subr.bf16.mxu0 %v1376_v47  ;;  %2766 = vmatprep.subr.bf16.mxu1 %v1376_v47  ;;  %v2969_v16 = vld [vmem:[#allocation4 + $0xf4] ss:$8 sps:$4 sm:$0xff]   ;;  %v2968_v17 = vld [vmem:[#allocation4 + $0x70] ss:$8 sps:$4 sm:$0xff]   ;;  %v1296_v22 = vld [vmem:[#allocation3] sm:$0xff] }
 0x2b4   : > { %v2971_v18 = vld [vmem:[#allocation4 + $0xf0] ss:$8 sps:$4 sm:$0xff]   ;;  %v1312_v24 = vld [vmem:[#allocation3 + $0x80] sm:$0xff]  ;;  %v1297_v31 = vld [vmem:[#allocation3 + $0x8] sm:$0xff] }
 0x2b5   : > { %v1313_v33 = vld [vmem:[#allocation3 + $0x88] sm:$0xff]  ;;  %v3465_v35 = vld [vmem:[%s3860_s4] ss:$0 sm:$0xff] }
 0x2b6   : > { %2595 = vmatpush3.bf16.msra.mxu0 %v1368_v48  ;;  %2774 = vmatpush3.bf16.msra.mxu1 %v1368_v48 }
 0x2b7   : > { %2596 = vmatprep.subr.bf16.mxu0 %v1377_v49  ;;  %2767 = vmatprep.subr.bf16.mxu1 %v1377_v49 }
 0x2ba   : > { %2597 = vmatpush3.bf16.msra.mxu0 %v1369_v50  ;;  %2775 = vmatpush3.bf16.msra.mxu1 %v1369_v50  ;;  %v1298_v50 = vld [vmem:[#allocation3 + $0x10] sm:$0xff] }
 0x2bb   : > { %2598 = vmatprep.subr.bf16.mxu0 %v1378_v51  ;;  %2768 = vmatprep.subr.bf16.mxu1 %v1378_v51 }
 0x2be   : > { %2599 = vmatpush3.bf16.msra.mxu0 %v1370_v52  ;;  %2776 = vmatpush3.bf16.msra.mxu1 %v1370_v52  ;;  %v1314_v52 = vld [vmem:[#allocation3 + $0x90] sm:$0xff] }
 0x2bf   : > { %2600 = vmatprep.subr.bf16.mxu0 %v1379_v53  ;;  %2769 = vmatprep.subr.bf16.mxu1 %v1379_v53 }
 0x2c2   : > { %2601 = vmatpush3.bf16.msra.mxu0 %v1371_v54  ;;  %2777 = vmatpush3.bf16.msra.mxu1 %v1371_v54 }
 0x2c5   : > { %1573 = vmatmul.mubr.bf16.vlgmr.msra.gmra.mrb[0].mxu0 %v2924_v55  ;;  %1637 = vmatmul.mubr.bf16.vlgmr.msra.gmra.mrb[0].mxu1 %v2927_v56 }
 0x2c6   : > { %1580 = vmatprep.mubr.bf16.mxu0 %v2930_v57  ;;  %1644 = vmatprep.mubr.bf16.mxu1 %v2933_v58 }
 0x2cd   : > { %1581 = vmatmul.mubr.bf16.gmra.mrb[4].mxu0 %v2932_v3  ;;  %1645 = vmatmul.mubr.bf16.gmra.mrb[4].mxu1 %v2935_v59  ;;  %v1299_v59 = vld [vmem:[#allocation3 + $0x18] sm:$0xff] }
 0x2ce   : > { %1588 = vmatprep.mubr.bf16.mxu0 %v2936_v61  ;;  %1652 = vmatprep.mubr.bf16.mxu1 %v2939_v62  ;;  %v1315_v62 = vld [vmem:[#allocation3 + $0x98] sm:$0xff] }
 0x2d5   : > { %1589 = vmatmul.mubr.bf16.gmra.mrb[8].mxu0 %v2938_v63  ;;  %1653 = vmatmul.mubr.bf16.gmra.mrb[8].mxu1 %v2941_v41 }
 0x2d6   : > { %1596 = vmatprep.mubr.bf16.mxu0 %v2942_v8  ;;  %1660 = vmatprep.mubr.bf16.mxu1 %v2945_v38 }
 0x2dd   : > { %1597 = vmatmul.mubr.bf16.gmra.mrb[12].mxu0 %v2944_v0  ;;  %1661 = vmatmul.mubr.bf16.gmra.mrb[12].mxu1 %v2947_v60 }
 0x2de   : > { %1604 = vmatprep.mubr.bf16.mxu0 %v2948_v1  ;;  %1668 = vmatprep.mubr.bf16.mxu1 %v2951_v2 }
 0x2e5   : > { %1605 = vmatmul.mubr.bf16.gmra.mrb[16].mxu0 %v2950_v4  ;;  %1669 = vmatmul.mubr.bf16.gmra.mrb[16].mxu1 %v2953_v5 }
 0x2e6   : > { %1612 = vmatprep.mubr.bf16.mxu0 %v2954_v6  ;;  %1676 = vmatprep.mubr.bf16.mxu1 %v2957_v7 }
 0x2ed   : > { %1613 = vmatmul.mubr.bf16.gmra.mrb[20].mxu0 %v2956_v9  ;;  %1677 = vmatmul.mubr.bf16.gmra.mrb[20].mxu1 %v2959_v10 }
 0x2ee   : > { %1620 = vmatprep.mubr.bf16.mxu0 %v2960_v11  ;;  %1684 = vmatprep.mubr.bf16.mxu1 %v2963_v12  ;;  %v1300_v12 = vld [vmem:[#allocation3 + $0x20] sm:$0xff] }
 0x2f5   : > { %1621 = vmatmul.mubr.bf16.gmra.mrb[24].mxu0 %v2962_v13  ;;  %1685 = vmatmul.mubr.bf16.gmra.mrb[24].mxu1 %v2965_v14  ;;  %v1316_v14 = vld [vmem:[#allocation3 + $0xa0] sm:$0xff] }
 0x2f6   : > { %1628 = vmatprep.mubr.bf16.mxu0 %v2966_v15  ;;  %1692 = vmatprep.mubr.bf16.mxu1 %v2969_v16 }
 0x2fd   : > { %1629 = vmatmul.mubr.bf16.gmra.mrb[28].mxu0 %v2968_v17  ;;  %1693 = vmatmul.mubr.bf16.gmra.mrb[28].mxu1 %v2971_v18 }
 0x398   : > { %v2602_v20 = vpop.f32.mrb[0].mxu0  ;;  %v2650_v21 = vpop.f32.mrb[0].mxu1 }
 0x399   : > { %v2603_v23 = vpop.f32.mrb[1].mxu0  ;;  %v2651_v25 = vpop.f32.mrb[1].mxu1 }
 0x39a   : > { %v2604_v27 = vadd.f32 %v2603_v23, %v2602_v20  ;;  %v2652_v28 = vadd.f32 %v2651_v25, %v2650_v21  ;;  %v2605_v29 = vpop.f32.mrb[2].mxu0  ;;  %v2653_v30 = vpop.f32.mrb[2].mxu1  ;;  %v1301_v23 = vld [vmem:[#allocation3 + $0x28] sm:$0xff] }
 0x39b   : > { %v2606_v32 = vpop.f32.mrb[3].mxu0  ;;  %v2654_v34 = vpop.f32.mrb[3].mxu1  ;;  %v1317_v25 = vld [vmem:[#allocation3 + $0xa8] sm:$0xff] }
 0x39c   : > { %v1701_v36 = vadd.f32 %v2604_v27, %v1296_v22  ;;  %v1717_v37 = vadd.f32 %v2652_v28, %v1312_v24  ;;  %v2607_v39 = vadd.f32 %v2606_v32, %v2605_v29  ;;  %v2655_v40 = vadd.f32 %v2654_v34, %v2653_v30 }
 0x39e   : > { %1733 = vst [vmem:[#allocation3] sm:$0xff] %v1701_v36  ;;  %1749 = vst [vmem:[#allocation3 + $0x80] sm:$0xff] %v1717_v37  ;;  %v1702_v42 = vadd.f32 %v2607_v39, %v1297_v31  ;;  %v1718_v43 = vadd.f32 %v2655_v40, %v1313_v33  ;;  %v1807_v44 = vadd.f32 %v3465_v35, %v1701_v36 }
 0x39f   : > { %v1823_v45 = vadd.f32 %v3465_v35, %v1717_v37 }
 0x3a0   : > { %1734 = vst [vmem:[#allocation3 + $0x8] sm:$0xff] %v1702_v42  ;;  %1750 = vst [vmem:[#allocation3 + $0x88] sm:$0xff] %v1718_v43  ;;  %v2608_v46 = vpop.f32.mrb[4].mxu0  ;;  %v2656_v47 = vpop.f32.mrb[4].mxu1  ;;  %v3472_v48 = vsel %vm1841_vm0, %v1807_v44, -1e+30  ;;  %v1824_v49 = vadd.f32 %v3465_v35, %v1718_v43  ;;  %v1808_v41 = vadd.f32 %v3465_v35, %v1702_v42 }
 0x3a1   : > { %v2609_v51 = vpop.f32.mrb[5].mxu0  ;;  %v2657_v53 = vpop.f32.mrb[5].mxu1  ;;  %1874 = vmax.xlane.f32.xlu0 %v3472_v48  ;;  %v3482_v3 = vsel %vm1841_vm0, %v1823_v45, -1e+30  ;;  %v1302_v44 = vld [vmem:[#allocation3 + $0x30] sm:$0xff] }
 0x3a2   : > { %v2610_v54 = vadd.f32 %v2609_v51, %v2608_v46  ;;  %v2611_v55 = vpop.f32.mrb[6].mxu0  ;;  %v2658_v56 = vadd.f32 %v2657_v53, %v2656_v47  ;;  %v2659_v57 = vpop.f32.mrb[6].mxu1  ;;  %v3478_v58 = vsel %vm1841_vm0, %v1824_v49, -1e+30  ;;  %v3495_v10 = vsel %vm1841_vm0, %v1808_v41, -1e+30 }
 0x3a3   : > { %v2612_v61 = vpop.f32.mrb[7].mxu0  ;;  %v2660_v63 = vpop.f32.mrb[7].mxu1  ;;  %1908 = vmax.xlane.f32.xlu1 %v3478_v58  ;;  %v1318_v46 = vld [vmem:[#allocation3 + $0xb0] sm:$0xff] }
 0x3a4   : > { %v1703_v8 = vadd.f32 %v2610_v54, %v1298_v50  ;;  %v2613_v38 = vadd.f32 %v2612_v61, %v2611_v55  ;;  %v1719_v0 = vadd.f32 %v2658_v56, %v1314_v52  ;;  %v2661_v60 = vadd.f32 %v2660_v63, %v2659_v57  ;;  %v1303_v56 = vld [vmem:[#allocation3 + $0x38] sm:$0xff] }
 0x3a5   : > { %1906 = vmax.xlane.f32.xlu0 %v3482_v3 }
 0x3a6   : > { %1735 = vst [vmem:[#allocation3 + $0x10] sm:$0xff] %v1703_v8  ;;  %v1704_v1 = vadd.f32 %v2613_v38, %v1299_v59  ;;  %1751 = vst [vmem:[#allocation3 + $0x90] sm:$0xff] %v1719_v0  ;;  %v1720_v2 = vadd.f32 %v2661_v60, %v1315_v62  ;;  %v1809_v4 = vadd.f32 %v3465_v35, %v1703_v8  ;;  %v1319_v59 = vld [vmem:[#allocation3 + $0xb8] sm:$0xff] }
 0x3a7   : > { %v1825_v5 = vadd.f32 %v3465_v35, %v1719_v0 }
 0x3a8   : > { %1736 = vst [vmem:[#allocation3 + $0x18] sm:$0xff] %v1704_v1  ;;  %v2614_v6 = vpop.f32.mrb[8].mxu0  ;;  %1752 = vst [vmem:[#allocation3 + $0x98] sm:$0xff] %v1720_v2  ;;  %v2662_v7 = vpop.f32.mrb[8].mxu1  ;;  %v3491_v9 = vsel %vm1841_vm0, %v1809_v4, -1e+30  ;;  %v1810_v11 = vadd.f32 %v3465_v35, %v1704_v1  ;;  %v1826_v16 = vadd.f32 %v3465_v35, %v1720_v2 }
 0x3a9   : > { %v2615_v13 = vpop.f32.mrb[9].mxu0  ;;  %v2663_v15 = vpop.f32.mrb[9].mxu1  ;;  %1878 = vmax.xlane.f32.xlu1 %v3491_v9  ;;  %1876 = vmax.xlane.f32.xlu0 %v3495_v10  ;;  %v3507_v22 = vsel %vm1841_vm0, %v1825_v5, -1e+30 }
 0x3aa   : > { %v2616_v17 = vadd.f32 %v2615_v13, %v2614_v6  ;;  %v2617_v18 = vpop.f32.mrb[10].mxu0  ;;  %v2664_v19 = vadd.f32 %v2663_v15, %v2662_v7  ;;  %v2665_v20 = vpop.f32.mrb[10].mxu1  ;;  %v3503_v21 = vsel %vm1841_vm0, %v1810_v11, -1e+30  ;;  %v3513_v32 = vsel %vm1841_vm0, %v1826_v16, -1e+30 }
 0x3ab   : > { %v2618_v24 = vpop.f32.mrb[11].mxu0  ;;  %v2666_v27 = vpop.f32.mrb[11].mxu1  ;;  %v1304_v11 = vld [vmem:[#allocation3 + $0x40] sm:$0xff] }
 0x3ac   : > { %v1705_v28 = vadd.f32 %v2616_v17, %v1300_v12  ;;  %v2619_v29 = vadd.f32 %v2618_v24, %v2617_v18  ;;  %v1721_v30 = vadd.f32 %v2664_v19, %v1316_v14  ;;  %v2667_v31 = vadd.f32 %v2666_v27, %v2665_v20  ;;  %v1320_v13 = vld [vmem:[#allocation3 + $0xc0] sm:$0xff]  ;;  %v1305_v24 = vld [vmem:[#allocation3 + $0x48] sm:$0xff] }
 0x3ad   : > { %1880 = vmax.xlane.f32.xlu1 %v3503_v21  ;;  %1910 = vmax.xlane.f32.xlu0 %v3507_v22  ;;  %v1321_v27 = vld [vmem:[#allocation3 + $0xc8] sm:$0xff] }
 0x3ae   : > { %1737 = vst [vmem:[#allocation3 + $0x20] sm:$0xff] %v1705_v28  ;;  %v1706_v33 = vadd.f32 %v2619_v29, %v1301_v23  ;;  %1753 = vst [vmem:[#allocation3 + $0xa0] sm:$0xff] %v1721_v30  ;;  %v1722_v34 = vadd.f32 %v2667_v31, %v1317_v25  ;;  %v1811_v36 = vadd.f32 %v3465_v35, %v1705_v28 }
 0x3af   : > { %v1827_v37 = vadd.f32 %v3465_v35, %v1721_v30 }
 0x3b0   : > { %1738 = vst [vmem:[#allocation3 + $0x28] sm:$0xff] %v1706_v33  ;;  %v2620_v39 = vpop.f32.mrb[12].mxu0  ;;  %1754 = vst [vmem:[#allocation3 + $0xa8] sm:$0xff] %v1722_v34  ;;  %v2668_v40 = vpop.f32.mrb[12].mxu1  ;;  %v3519_v42 = vsel %vm1841_vm0, %v1811_v36, -1e+30  ;;  %v1812_v43 = vadd.f32 %v3465_v35, %v1706_v33  ;;  %v1828_v49 = vadd.f32 %v3465_v35, %v1722_v34 }
 0x3b1   : > { %v2621_v45 = vpop.f32.mrb[13].mxu0  ;;  %v2669_v47 = vpop.f32.mrb[13].mxu1  ;;  %1912 = vmax.xlane.f32.xlu1 %v3513_v32  ;;  %1882 = vmax.xlane.f32.xlu0 %v3519_v42  ;;  %v3531_v55 = vsel %vm1841_vm0, %v1827_v37, -1e+30 }
 0x3b2   : > { %v2622_v50 = vadd.f32 %v2621_v45, %v2620_v39  ;;  %v2623_v51 = vpop.f32.mrb[14].mxu0  ;;  %v2670_v52 = vadd.f32 %v2669_v47, %v2668_v40  ;;  %v2671_v53 = vpop.f32.mrb[14].mxu1  ;;  %v3527_v54 = vsel %vm1841_vm0, %v1812_v43, -1e+30  ;;  %v3537_v38 = vsel %vm1841_vm0, %v1828_v49, -1e+30 }
 0x3b3   : > { %v2624_v57 = vpop.f32.mrb[15].mxu0  ;;  %v2672_v61 = vpop.f32.mrb[15].mxu1  ;;  %v1306_v47 = vld [vmem:[#allocation3 + $0x50] sm:$0xff] }
 0x3b4   : > { %v1707_v62 = vadd.f32 %v2622_v50, %v1302_v44  ;;  %v2625_v63 = vadd.f32 %v2624_v57, %v2623_v51  ;;  %v1723_v41 = vadd.f32 %v2670_v52, %v1318_v46  ;;  %v2673_v8 = vadd.f32 %v2672_v61, %v2671_v53  ;;  %v1322_v50 = vld [vmem:[#allocation3 + $0xd0] sm:$0xff] }
 0x3b5   : > { %1884 = vmax.xlane.f32.xlu1 %v3527_v54  ;;  %1914 = vmax.xlane.f32.xlu0 %v3531_v55 }
 0x3b6   : > { %1739 = vst [vmem:[#allocation3 + $0x30] sm:$0xff] %v1707_v62  ;;  %v1708_v0 = vadd.f32 %v2625_v63, %v1303_v56  ;;  %1755 = vst [vmem:[#allocation3 + $0xb0] sm:$0xff] %v1723_v41  ;;  %v1724_v60 = vadd.f32 %v2673_v8, %v1319_v59  ;;  %v1813_v1 = vadd.f32 %v3465_v35, %v1707_v62  ;;  %v1307_v63 = vld [vmem:[#allocation3 + $0x58] sm:$0xff] }
 0x3b7   : > { %v1829_v2 = vadd.f32 %v3465_v35, %v1723_v41  ;;  %v1323_v8 = vld [vmem:[#allocation3 + $0xd8] sm:$0xff] }
 0x3b8   : > { %1740 = vst [vmem:[#allocation3 + $0x38] sm:$0xff] %v1708_v0  ;;  %v2626_v4 = vpop.f32.mrb[16].mxu0  ;;  %1756 = vst [vmem:[#allocation3 + $0xb8] sm:$0xff] %v1724_v60  ;;  %v2674_v5 = vpop.f32.mrb[16].mxu1  ;;  %v3543_v6 = vsel %vm1841_vm0, %v1813_v1, -1e+30  ;;  %v1814_v7 = vadd.f32 %v3465_v35, %v1708_v0  ;;  %v1830_v15 = vadd.f32 %v3465_v35, %v1724_v60 }
 0x3b9   : > { %v2627_v12 = vpop.f32.mrb[17].mxu0  ;;  %v2675_v14 = vpop.f32.mrb[17].mxu1  ;;  %1916 = vmax.xlane.f32.xlu1 %v3537_v38  ;;  %1886 = vmax.xlane.f32.xlu0 %v3543_v6  ;;  %v3555_v23 = vsel %vm1841_vm0, %v1829_v2, -1e+30 }
 0x3ba   : > { %v2628_v16 = vadd.f32 %v2627_v12, %v2626_v4  ;;  %v2629_v17 = vpop.f32.mrb[18].mxu0  ;;  %v2676_v18 = vadd.f32 %v2675_v14, %v2674_v5  ;;  %v2677_v19 = vpop.f32.mrb[18].mxu1  ;;  %v3551_v20 = vsel %vm1841_vm0, %v1814_v7, -1e+30  ;;  %v3561_v34 = vsel %vm1841_vm0, %v1830_v15, -1e+30 }
 0x3bb   : > { %v2630_v25 = vpop.f32.mrb[19].mxu0  ;;  %v2678_v28 = vpop.f32.mrb[19].mxu1 }
 0x3bc   : > { %v1709_v29 = vadd.f32 %v2628_v16, %v1304_v11  ;;  %v2631_v30 = vadd.f32 %v2630_v25, %v2629_v17  ;;  %v1725_v31 = vadd.f32 %v2676_v18, %v1320_v13  ;;  %v2679_v33 = vadd.f32 %v2678_v28, %v2677_v19  ;;  %v1308_v18 = vld [vmem:[#allocation3 + $0x60] sm:$0xff] }
 0x3bd   : > { %1888 = vmax.xlane.f32.xlu1 %v3551_v20  ;;  %1918 = vmax.xlane.f32.xlu0 %v3555_v23 }
 0x3be   : > { %1741 = vst [vmem:[#allocation3 + $0x40] sm:$0xff] %v1709_v29  ;;  %v1710_v36 = vadd.f32 %v2631_v30, %v1305_v24  ;;  %1757 = vst [vmem:[#allocation3 + $0xc0] sm:$0xff] %v1725_v31  ;;  %v1726_v37 = vadd.f32 %v2679_v33, %v1321_v27  ;;  %v1815_v39 = vadd.f32 %v3465_v35, %v1709_v29  ;;  %v1324_v24 = vld [vmem:[#allocation3 + $0xe0] sm:$0xff] }
 0x3bf   : > { %v1831_v40 = vadd.f32 %v3465_v35, %v1725_v31 }
 0x3c0   : > { %1742 = vst [vmem:[#allocation3 + $0x48] sm:$0xff] %v1710_v36  ;;  %v2632_v43 = vpop.f32.mrb[20].mxu0  ;;  %1758 = vst [vmem:[#allocation3 + $0xc8] sm:$0xff] %v1726_v37  ;;  %v2680_v44 = vpop.f32.mrb[20].mxu1  ;;  %v3567_v45 = vsel %vm1841_vm0, %v1815_v39, -1e+30  ;;  %v1816_v46 = vadd.f32 %v3465_v35, %v1710_v36  ;;  %v1832_v52 = vadd.f32 %v3465_v35, %v1726_v37 }
 0x3c1   : > { %v2633_v49 = vpop.f32.mrb[21].mxu0  ;;  %v2681_v51 = vpop.f32.mrb[21].mxu1  ;;  %1920 = vmax.xlane.f32.xlu1 %v3561_v34  ;;  %1890 = vmax.xlane.f32.xlu0 %v3567_v45  ;;  %v3579_v62 = vsel %vm1841_vm0, %v1831_v40, -1e+30  ;;  %v1309_v37 = vld [vmem:[#allocation3 + $0x68] sm:$0xff] }
 0x3c2   : > { %v2634_v53 = vadd.f32 %v2633_v49, %v2632_v43  ;;  %v2635_v56 = vpop.f32.mrb[22].mxu0  ;;  %v2682_v57 = vadd.f32 %v2681_v51, %v2680_v44  ;;  %v2683_v59 = vpop.f32.mrb[22].mxu1  ;;  %v3575_v61 = vsel %vm1841_vm0, %v1816_v46, -1e+30  ;;  %v3585_v5 = vsel %vm1841_vm0, %v1832_v52, -1e+30 }
 0x3c3   : > { %v2636_v41 = vpop.f32.mrb[23].mxu0  ;;  %v2684_v0 = vpop.f32.mrb[23].mxu1  ;;  %v1325_v40 = vld [vmem:[#allocation3 + $0xe8] sm:$0xff] }
 0x3c4   : > { %v1711_v60 = vadd.f32 %v2634_v53, %v1306_v47  ;;  %v2637_v1 = vadd.f32 %v2636_v41, %v2635_v56  ;;  %v1727_v2 = vadd.f32 %v2682_v57, %v1322_v50  ;;  %v2685_v4 = vadd.f32 %v2684_v0, %v2683_v59 }
 0x3c5   : > { %1892 = vmax.xlane.f32.xlu1 %v3575_v61  ;;  %1922 = vmax.xlane.f32.xlu0 %v3579_v62 }
 0x3c6   : > { %1743 = vst [vmem:[#allocation3 + $0x50] sm:$0xff] %v1711_v60  ;;  %v1712_v7 = vadd.f32 %v2637_v1, %v1307_v63  ;;  %1759 = vst [vmem:[#allocation3 + $0xd0] sm:$0xff] %v1727_v2  ;;  %v1728_v11 = vadd.f32 %v2685_v4, %v1323_v8  ;;  %v1817_v12 = vadd.f32 %v3465_v35, %v1711_v60  ;;  %v1310_v8 = vld [vmem:[#allocation3 + $0x70] sm:$0xff] }
 0x3c7   : > { %v1833_v13 = vadd.f32 %v3465_v35, %v1727_v2  ;;  %v1326_v60 = vld [vmem:[#allocation3 + $0xf0] sm:$0xff] }
 0x3c8   : > { %1744 = vst [vmem:[#allocation3 + $0x58] sm:$0xff] %v1712_v7  ;;  %v2638_v14 = vpop.f32.mrb[24].mxu0  ;;  %1760 = vst [vmem:[#allocation3 + $0xd8] sm:$0xff] %v1728_v11  ;;  %v2686_v15 = vpop.f32.mrb[24].mxu1  ;;  %v3591_v16 = vsel %vm1841_vm0, %v1817_v12, -1e+30  ;;  %v1818_v17 = vadd.f32 %v3465_v35, %v1712_v7  ;;  %v1834_v27 = vadd.f32 %v3465_v35, %v1728_v11 }
 0x3c9   : > { %v2639_v19 = vpop.f32.mrb[25].mxu0  ;;  %v2687_v25 = vpop.f32.mrb[25].mxu1  ;;  %1924 = vmax.xlane.f32.xlu1 %v3585_v5  ;;  %1894 = vmax.xlane.f32.xlu0 %v3591_v16  ;;  %v3603_v36 = vsel %vm1841_vm0, %v1833_v13, -1e+30 }
 0x3ca   : > { %v2640_v28 = vadd.f32 %v2639_v19, %v2638_v14  ;;  %v2641_v29 = vpop.f32.mrb[26].mxu0  ;;  %v2688_v30 = vadd.f32 %v2687_v25, %v2686_v15  ;;  %v2689_v31 = vpop.f32.mrb[26].mxu1  ;;  %v3599_v33 = vsel %vm1841_vm0, %v1818_v17, -1e+30  ;;  %v3609_v50 = vsel %vm1841_vm0, %v1834_v27, -1e+30 }
 0x3cb   : > { %v2642_v39 = vpop.f32.mrb[27].mxu0  ;;  %v2690_v43 = vpop.f32.mrb[27].mxu1  ;;  %v1311_v15 = vld [vmem:[#allocation3 + $0x78] sm:$0xff] }
 0x3cc   : > { %v1713_v44 = vadd.f32 %v2640_v28, %v1308_v18  ;;  %v2643_v46 = vadd.f32 %v2642_v39, %v2641_v29  ;;  %v1729_v47 = vadd.f32 %v2688_v30, %v1324_v24  ;;  %v2691_v49 = vadd.f32 %v2690_v43, %v2689_v31  ;;  %v1327_v18 = vld [vmem:[#allocation3 + $0xf8] sm:$0xff] }
 0x3cd   : > { %1896 = vmax.xlane.f32.xlu1 %v3599_v33  ;;  %1926 = vmax.xlane.f32.xlu0 %v3603_v36 }
 0x3ce   : > { %1745 = vst [vmem:[#allocation3 + $0x60] sm:$0xff] %v1713_v44  ;;  %v1714_v51 = vadd.f32 %v2643_v46, %v1309_v37  ;;  %1761 = vst [vmem:[#allocation3 + $0xe0] sm:$0xff] %v1729_v47  ;;  %v1730_v52 = vadd.f32 %v2691_v49, %v1325_v40  ;;  %v1819_v53 = vadd.f32 %v3465_v35, %v1713_v44 }
 0x3cf   : > { %v1835_v56 = vadd.f32 %v3465_v35, %v1729_v47 }
 0x3d0   : > { %1746 = vst [vmem:[#allocation3 + $0x68] sm:$0xff] %v1714_v51  ;;  %v2644_v57 = vpop.f32.mrb[28].mxu0  ;;  %1762 = vst [vmem:[#allocation3 + $0xe8] sm:$0xff] %v1730_v52  ;;  %v2692_v59 = vpop.f32.mrb[28].mxu1  ;;  %v3615_v63 = vsel %vm1841_vm0, %v1819_v53, -1e+30  ;;  %v1820_v41 = vadd.f32 %v3465_v35, %v1714_v51  ;;  %v1836_v2 = vadd.f32 %v3465_v35, %v1730_v52 }
 0x3d1   : > { %v2645_v0 = vpop.f32.mrb[29].mxu0  ;;  %v2693_v1 = vpop.f32.mrb[29].mxu1  ;;  %1928 = vmax.xlane.f32.xlu1 %v3609_v50  ;;  %1898 = vmax.xlane.f32.xlu0 %v3615_v63  ;;  %v3627_v14 = vsel %vm1841_vm0, %v1835_v56, -1e+30 }
 0x3d2   : > { %v2646_v4 = vadd.f32 %v2645_v0, %v2644_v57  ;;  %v2647_v7 = vpop.f32.mrb[30].mxu0  ;;  %v2694_v11 = vadd.f32 %v2693_v1, %v2692_v59  ;;  %v2695_v12 = vpop.f32.mrb[30].mxu1  ;;  %v3623_v13 = vsel %vm1841_vm0, %v1820_v41, -1e+30  ;;  %v3633_v29 = vsel %vm1841_vm0, %v1836_v2, -1e+30 }
 0x3d3   : > { %v2648_v17 = vpop.f32.mrb[31].mxu0  ;;  %v2696_v19 = vpop.f32.mrb[31].mxu1 }
 0x3d4   : > { %v1715_v24 = vadd.f32 %v2646_v4, %v1310_v8  ;;  %v2649_v25 = vadd.f32 %v2648_v17, %v2647_v7  ;;  %v1731_v27 = vadd.f32 %v2694_v11, %v1326_v60  ;;  %v2697_v28 = vadd.f32 %v2696_v19, %v2695_v12 }
 0x3d5   : > { %1900 = vmax.xlane.f32.xlu1 %v3623_v13  ;;  %1930 = vmax.xlane.f32.xlu0 %v3627_v14 }
 0x3d6   : > { %1747 = vst [vmem:[#allocation3 + $0x70] sm:$0xff] %v1715_v24  ;;  %v1716_v30 = vadd.f32 %v2649_v25, %v1311_v15  ;;  %1763 = vst [vmem:[#allocation3 + $0xf0] sm:$0xff] %v1731_v27  ;;  %v1732_v31 = vadd.f32 %v2697_v28, %v1327_v18  ;;  %v1821_v37 = vadd.f32 %v3465_v35, %v1715_v24 }
 0x3d7   : > { %v1837_v39 = vadd.f32 %v3465_v35, %v1731_v27 }
 0x3d8   : > { %1748 = vst [vmem:[#allocation3 + $0x78] sm:$0xff] %v1716_v30  ;;  %1764 = vst [vmem:[#allocation3 + $0xf8] sm:$0xff] %v1732_v31  ;;  %v3639_v40 = vsel %vm1841_vm0, %v1821_v37, -1e+30  ;;  %v1822_v43 = vadd.f32 %v3465_v35, %v1716_v30  ;;  %v1838_v44 = vadd.f32 %v3465_v35, %v1732_v31 }
 0x3d9   : > { %1932 = vmax.xlane.f32.xlu1 %v3633_v29  ;;  %1902 = vmax.xlane.f32.xlu0 %v3639_v40  ;;  %v3651_v47 = vsel %vm1841_vm0, %v1837_v39, -1e+30 }
 0x3da   : > { %v3647_v46 = vsel %vm1841_vm0, %v1822_v43, -1e+30  ;;  %v3655_v49 = vsel %vm1841_vm0, %v1838_v44, -1e+30 }
 0x3dd   : > { %1904 = vmax.xlane.f32.xlu1 %v3647_v46  ;;  %1934 = vmax.xlane.f32.xlu0 %v3651_v47 }
 0x3e1   : > { %1936 = vmax.xlane.f32.xlu1 %v3655_v49 }
 0x42e   : > { %v1875_v35 = vpop.xlane.xlu0 %1874 }
 0x42f   : > { %v3661_v51 = vsub.f32 %v3472_v48, %v1875_v35 }
 0x430   : > { %v1909_v53 = vpop.xlane.xlu1 %1908 }
 0x431   : > { %v1970_v52 = vmul.f32 1.442695, %v3661_v51  ;;  %v3669_v8 = vsub.f32 %v3478_v58, %v1909_v53 }
 0x432   : > { %v1907_v56 = vpop.xlane.xlu0 %1906 }
 0x433   : > { %2972 = vpow2.f32 %v1970_v52  ;;  %v3665_v57 = vsub.f32 %v3482_v3, %v1907_v56  ;;  %v2004_v4 = vmul.f32 1.442695, %v3669_v8 }
 0x435   : > { %v2002_v26 = vmul.f32 1.442695, %v3665_v57 }
 0x436   : > { %v1879_v59 = vpop.xlane.xlu1 %1878  ;;  %v1877_v41 = vpop.xlane.xlu0 %1876 }
 0x437   : > { %2974 = vpow2.f32 %v2002_v26  ;;  %v3672_v0 = vsub.f32 %v3491_v9, %v1879_v59  ;;  %v3675_v48 = vsub.f32 %v3495_v10, %v1877_v41 }
 0x439   : > { %v1974_v60 = vmul.f32 1.442695, %v3672_v0  ;;  %v1972_v1 = vmul.f32 1.442695, %v3675_v48 }
 0x43a   : > { %v1881_v3 = vpop.xlane.xlu1 %1880  ;;  %v1911_v2 = vpop.xlane.xlu0 %1910 }
 0x43b   : > { %2976 = vpow2.f32 %v1974_v60  ;;  %v3681_v7 = vsub.f32 %v3503_v21, %v1881_v3  ;;  %v3684_v58 = vsub.f32 %v3507_v22, %v1911_v2 }
 0x43c   : > { %2978 = vpow2.f32 %v1972_v1 }
 0x43d   : > { %v2973_v9 = vpop.eup %2972  ;;  %v2006_v10 = vmul.f32 1.442695, %v3684_v58  ;;  %2980 = vpow2.f32 %v2004_v4  ;;  %v1976_v15 = vmul.f32 1.442695, %v3681_v7 }
 0x43e   : > { %v1913_v11 = vpop.xlane.xlu1 %1912  ;;  %2034 = vadd.xlane.f32.xlu0 %v2973_v9  ;;  %v1883_v12 = vpop.xlane.xlu0 %1882 }
 0x43f   : > { %v3689_v17 = vsub.f32 %v3513_v32, %v1913_v11  ;;  %v3692_v18 = vsub.f32 %v3519_v42, %v1883_v12  ;;  %2982 = vpow2.f32 %v2006_v10 }
 0x440   : > { %2984 = vpow2.f32 %v1976_v15 }
 0x441   : > { %v2975_v21 = vpop.eup %2974  ;;  %v1978_v22 = vmul.f32 1.442695, %v3692_v18  ;;  %v2008_v25 = vmul.f32 1.442695, %v3689_v17 }
 0x442   : > { %v1885_v19 = vpop.xlane.xlu1 %1884  ;;  %2066 = vadd.xlane.f32.xlu0 %v2975_v21  ;;  %v1915_v24 = vpop.xlane.xlu0 %1914 }
 0x443   : > { %v3697_v27 = vsub.f32 %v3527_v54, %v1885_v19  ;;  %v3700_v28 = vsub.f32 %v3531_v55, %v1915_v24  ;;  %2986 = vpow2.f32 %v1978_v22 }
 0x444   : > { %2988 = vpow2.f32 %v2008_v25 }
 0x445   : > { %v2977_v32 = vpop.eup %2976  ;;  %v2010_v42 = vmul.f32 1.442695, %v3700_v28  ;;  %v1980_v39 = vmul.f32 1.442695, %v3697_v27 }
 0x446   : > { %v2979_v30 = vpop.eup %2978  ;;  %v1917_v31 = vpop.xlane.xlu1 %1916  ;;  %2038 = vadd.xlane.f32.xlu0 %v2977_v32 }
 0x447   : > { %v1887_v37 = vpop.xlane.xlu0 %1886  ;;  %v3705_v43 = vsub.f32 %v3537_v38, %v1917_v31  ;;  %2036 = vadd.xlane.f32.xlu1 %v2979_v30  ;;  %2990 = vpow2.f32 %v2010_v42  ;;  %v2981_v55 = vpop.eup %2980 }
 0x448   : > { %v3708_v54 = vsub.f32 %v3543_v6, %v1887_v37  ;;  %2992 = vpow2.f32 %v1980_v39 }
 0x449   : > { %v2983_v35 = vpop.eup %2982  ;;  %v2012_v56 = vmul.f32 1.442695, %v3705_v43 }
 0x44a   : > { %v1982_v44 = vmul.f32 1.442695, %v3708_v54  ;;  %v1889_v52 = vpop.xlane.xlu1 %1888  ;;  %2070 = vadd.xlane.f32.xlu0 %v2983_v35  ;;  %v2985_v6 = vpop.eup %2984 }
 0x44b   : > { %v1919_v53 = vpop.xlane.xlu0 %1918  ;;  %v3713_v26 = vsub.f32 %v3551_v20, %v1889_v52  ;;  %2068 = vadd.xlane.f32.xlu1 %v2981_v55 }
 0x44c   : > { %v3716_v38 = vsub.f32 %v3555_v23, %v1919_v53  ;;  %2994 = vpow2.f32 %v1982_v44 }
 0x44d   : > { %v2987_v41 = vpop.eup %2986  ;;  %2996 = vpow2.f32 %v2012_v56  ;;  %v1984_v3 = vmul.f32 1.442695, %v3713_v26 }
 0x44e   : > { %v2014_v59 = vmul.f32 1.442695, %v3716_v38  ;;  %v1921_v60 = vpop.xlane.xlu1 %1920  ;;  %2042 = vadd.xlane.f32.xlu0 %v2987_v41  ;;  %v2989_v23 = vpop.eup %2988 }
 0x44f   : > { %v1891_v1 = vpop.xlane.xlu0 %1890  ;;  %v3721_v2 = vsub.f32 %v3561_v34, %v1921_v60  ;;  %2040 = vadd.xlane.f32.xlu1 %v2985_v6 }
 0x450   : > { %v3724_v20 = vsub.f32 %v3567_v45, %v1891_v1  ;;  %2998 = vpow2.f32 %v2014_v59 }
 0x451   : > { %v2991_v9 = vpop.eup %2990  ;;  %3000 = vpow2.f32 %v1984_v3  ;;  %v2016_v12 = vmul.f32 1.442695, %v3721_v2 }
 0x452   : > { %v1986_v4 = vmul.f32 1.442695, %v3724_v20  ;;  %v1893_v10 = vpop.xlane.xlu1 %1892  ;;  %2074 = vadd.xlane.f32.xlu0 %v2991_v9  ;;  %v2993_v45 = vpop.eup %2992 }
 0x453   : > { %v1923_v11 = vpop.xlane.xlu0 %1922  ;;  %v3729_v15 = vsub.f32 %v3575_v61, %v1893_v10  ;;  %2072 = vadd.xlane.f32.xlu1 %v2989_v23 }
 0x454   : > { %v3732_v34 = vsub.f32 %v3579_v62, %v1923_v11  ;;  %3002 = vpow2.f32 %v1986_v4 }
 0x455   : > { %3004 = vpow2.f32 %v2016_v12  ;;  %v1988_v25 = vmul.f32 1.442695, %v3729_v15 }
 0x456   : > { %v2018_v21 = vmul.f32 1.442695, %v3732_v34  ;;  %v2995_v22 = vpop.eup %2994  ;;  %v1925_v19 = vpop.xlane.xlu1 %1924 }
 0x457   : > { %v1895_v24 = vpop.xlane.xlu0 %1894  ;;  %v3737_v32 = vsub.f32 %v3585_v5, %v1925_v19  ;;  %2044 = vadd.xlane.f32.xlu1 %v2993_v45  ;;  %2046 = vadd.xlane.f32.xlu0 %v2995_v22  ;;  %v2997_v62 = vpop.eup %2996 }
 0x458   : > { %v3740_v61 = vsub.f32 %v3591_v16, %v1895_v24  ;;  %3006 = vpow2.f32 %v2018_v21 }
 0x459   : > { %3008 = vpow2.f32 %v1988_v25  ;;  %v2020_v39 = vmul.f32 1.442695, %v3737_v32 }
 0x45a   : > { %v1990_v42 = vmul.f32 1.442695, %v3740_v61  ;;  %v2999_v30 = vpop.eup %2998  ;;  %v1897_v31 = vpop.xlane.xlu1 %1896 }
 0x45b   : > { %v1927_v37 = vpop.xlane.xlu0 %1926  ;;  %v3745_v55 = vsub.f32 %v3599_v33, %v1897_v31  ;;  %2076 = vadd.xlane.f32.xlu1 %v2997_v62  ;;  %2078 = vadd.xlane.f32.xlu0 %v2999_v30  ;;  %v3001_v16 = vpop.eup %3000 }
 0x45c   : > { %v3748_v5 = vsub.f32 %v3603_v36, %v1927_v37  ;;  %3010 = vpow2.f32 %v1990_v42 }
 0x45d   : > { %3012 = vpow2.f32 %v2020_v39  ;;  %v1992_v56 = vmul.f32 1.442695, %v3745_v55 }
 0x45e   : > { %v2022_v44 = vmul.f32 1.442695, %v3748_v5  ;;  %v3003_v35 = vpop.eup %3002  ;;  %v1929_v52 = vpop.xlane.xlu1 %1928 }
 0x45f   : > { %v1899_v53 = vpop.xlane.xlu0 %1898  ;;  %v3753_v6 = vsub.f32 %v3609_v50, %v1929_v52  ;;  %2048 = vadd.xlane.f32.xlu1 %v3001_v16  ;;  %2050 = vadd.xlane.f32.xlu0 %v3003_v35  ;;  %v3005_v36 = vpop.eup %3004 }
 0x460   : > { %v3756_v33 = vsub.f32 %v3615_v63, %v1899_v53  ;;  %3014 = vpow2.f32 %v2022_v44 }
 0x461   : > { %3016 = vpow2.f32 %v1992_v56  ;;  %v2024_v3 = vmul.f32 1.442695, %v3753_v6 }
 0x462   : > { %v1994_v59 = vmul.f32 1.442695, %v3756_v33  ;;  %v3007_v41 = vpop.eup %3006  ;;  %v1901_v60 = vpop.xlane.xlu1 %1900 }
 0x463   : > { %v1931_v1 = vpop.xlane.xlu0 %1930  ;;  %v3761_v23 = vsub.f32 %v3623_v13, %v1901_v60  ;;  %2080 = vadd.xlane.f32.xlu1 %v3005_v36  ;;  %2082 = vadd.xlane.f32.xlu0 %v3007_v41  ;;  %v3009_v63 = vpop.eup %3008 }
 0x464   : > { %v3764_v50 = vsub.f32 %v3627_v14, %v1931_v1  ;;  %3018 = vpow2.f32 %v1994_v59 }
 0x465   : > { %3020 = vpow2.f32 %v2024_v3  ;;  %v1996_v12 = vmul.f32 1.442695, %v3761_v23 }
 0x466   : > { %v2026_v4 = vmul.f32 1.442695, %v3764_v50  ;;  %v3011_v9 = vpop.eup %3010  ;;  %v1933_v10 = vpop.xlane.xlu1 %1932 }
 0x467   : > { %v1903_v11 = vpop.xlane.xlu0 %1902  ;;  %v3769_v45 = vsub.f32 %v3633_v29, %v1933_v10  ;;  %2052 = vadd.xlane.f32.xlu1 %v3009_v63  ;;  %2054 = vadd.xlane.f32.xlu0 %v3011_v9  ;;  %v3013_v14 = vpop.eup %3012 }
 0x468   : > { %v3772_v13 = vsub.f32 %v3639_v40, %v1903_v11  ;;  %3022 = vpow2.f32 %v2026_v4 }
 0x469   : > { %3024 = vpow2.f32 %v1996_v12  ;;  %v2028_v25 = vmul.f32 1.442695, %v3769_v45 }
 0x46a   : > { %v1998_v21 = vmul.f32 1.442695, %v3772_v13  ;;  %v3015_v22 = vpop.eup %3014  ;;  %v1905_v19 = vpop.xlane.xlu1 %1904 }
 0x46b   : > { %v1935_v24 = vpop.xlane.xlu0 %1934  ;;  %2084 = vadd.xlane.f32.xlu1 %v3013_v14  ;;  %2086 = vadd.xlane.f32.xlu0 %v3015_v22  ;;  %v3780_v62 = vsub.f32 %v3647_v46, %v1905_v19  ;;  %v3017_v40 = vpop.eup %3016 }
 0x46c   : > { %v3777_v29 = vsub.f32 %v3651_v47, %v1935_v24  ;;  %3026 = vpow2.f32 %v1998_v21 }
 0x46d   : > { %3028 = vpow2.f32 %v2028_v25  ;;  %v2000_v37 = vmul.f32 1.442695, %v3780_v62 }
 0x46e   : > { %v2030_v42 = vmul.f32 1.442695, %v3777_v29  ;;  %v3019_v30 = vpop.eup %3018  ;;  %v1937_v31 = vpop.xlane.xlu1 %1936 }
 0x46f   : > { %2056 = vadd.xlane.f32.xlu1 %v3017_v40  ;;  %2058 = vadd.xlane.f32.xlu0 %v3019_v30  ;;  %v3785_v39 = vsub.f32 %v3655_v49, %v1937_v31  ;;  %v3021_v47 = vpop.eup %3020 }
 0x470   : > { %3030 = vpow2.f32 %v2030_v42 }
 0x471   : > { %3032 = vpow2.f32 %v2000_v37  ;;  %v2032_v46 = vmul.f32 1.442695, %v3785_v39 }
 0x472   : > { %v3023_v16 = vpop.eup %3022 }
 0x473   : > { %2088 = vadd.xlane.f32.xlu1 %v3021_v47  ;;  %2090 = vadd.xlane.f32.xlu0 %v3023_v16  ;;  %v3025_v44 = vpop.eup %3024  ;;  %3034 = vpow2.f32 %v2032_v46 }
 0x476   : > { %v3027_v35 = vpop.eup %3026 }
 0x477   : > { %2060 = vadd.xlane.f32.xlu1 %v3025_v44  ;;  %2062 = vadd.xlane.f32.xlu0 %v3027_v35  ;;  %v3029_v52 = vpop.eup %3028 }
 0x47a   : > { %v3031_v53 = vpop.eup %3030 }
 0x47b   : > { %2092 = vadd.xlane.f32.xlu1 %v3029_v52  ;;  %2094 = vadd.xlane.f32.xlu0 %v3031_v53  ;;  %v3033_v56 = vpop.eup %3032 }
 0x47d   : > { %v3035_v49 = vpop.eup %3034 }
 0x47f   : > { %2064 = vadd.xlane.f32.xlu1 %v3033_v56 }
 0x483   : > { %2096 = vadd.xlane.f32.xlu1 %v3035_v49 }
 0x4cb   : > { %v2035_v36 = vpop.xlane.xlu0 %2034 }
 0x4cc   : > { %3036 = vlog2.f32 %v2035_v36 }
 0x4cf   : > { %v2067_v59 = vpop.xlane.xlu0 %2066 }
 0x4d0   : > { %3038 = vlog2.f32 %v2067_v59 }
 0x4d3   : > { %v2039_v41 = vpop.xlane.xlu0 %2038 }
 0x4d4   : > { %v2037_v60 = vpop.xlane.xlu1 %2036  ;;  %3040 = vlog2.f32 %v2039_v41 }
 0x4d5   : > { %3042 = vlog2.f32 %v2037_v60 }
 0x4d6   : > { %v3037_v1 = vpop.eup %3036 }
 0x4d7   : > { %v2099_v3 = vmul.f32 0.6931472, %v3037_v1  ;;  %v2071_v4 = vpop.xlane.xlu0 %2070 }
 0x4d8   : > { %v2069_v63 = vpop.xlane.xlu1 %2068 }
 0x4d9   : > { %v2162_v9 = vsub.f32 %v3661_v51, %v2099_v3  ;;  %3044 = vlog2.f32 %v2069_v63 }
 0x4da   : > { %v3039_v10 = vpop.eup %3038  ;;  %3046 = vlog2.f32 %v2071_v4 }
 0x4db   : > { %2194 = vst [vmem:[#allocation10] sm:$0xff] %v2162_v9  ;;  %v2131_v11 = vmul.f32 0.6931472, %v3039_v10  ;;  %v2043_v14 = vpop.xlane.xlu0 %2042 }
 0x4dc   : > { %v2041_v12 = vpop.xlane.xlu1 %2040 }
 0x4dd   : > { %v2178_v21 = vsub.f32 %v3665_v57, %v2131_v11  ;;  %3048 = vlog2.f32 %v2041_v12 }
 0x4de   : > { %v3041_v22 = vpop.eup %3040  ;;  %3050 = vlog2.f32 %v2043_v14 }
 0x4df   : > { %v3043_v19 = vpop.eup %3042  ;;  %2210 = vst [vmem:[#allocation10 + $0x80] sm:$0xff] %v2178_v21  ;;  %v2103_v24 = vmul.f32 0.6931472, %v3041_v22  ;;  %v2075_v42 = vpop.xlane.xlu0 %2074 }
 0x4e0   : > { %v2101_v25 = vmul.f32 0.6931472, %v3043_v19  ;;  %v2073_v40 = vpop.xlane.xlu1 %2072 }
 0x4e1   : > { %v2164_v51 = vsub.f32 %v3672_v0, %v2103_v24  ;;  %3052 = vlog2.f32 %v2073_v40 }
 0x4e2   : > { %v2163_v30 = vsub.f32 %v3675_v48, %v2101_v25  ;;  %3054 = vlog2.f32 %v2075_v42 }
 0x4e3   : > { %v3045_v31 = vpop.eup %3044  ;;  %2196 = vst [vmem:[#allocation10 + $0x10] sm:$0xff] %v2164_v51 }
 0x4e4   : > { %v3047_v37 = vpop.eup %3046  ;;  %2195 = vst [vmem:[#allocation10 + $0x8] sm:$0xff] %v2163_v30  ;;  %v2133_v57 = vmul.f32 0.6931472, %v3045_v31  ;;  %v2045_v47 = vpop.xlane.xlu1 %2044 }
 0x4e5   : > { %v2047_v16 = vpop.xlane.xlu0 %2046  ;;  %v2135_v46 = vmul.f32 0.6931472, %v3047_v37  ;;  %3056 = vlog2.f32 %v2045_v47 }
 0x4e6   : > { %v2179_v44 = vsub.f32 %v3669_v8, %v2133_v57  ;;  %3058 = vlog2.f32 %v2047_v16 }
 0x4e7   : > { %v3049_v35 = vpop.eup %3048  ;;  %v2180_v52 = vsub.f32 %v3684_v58, %v2135_v46 }
 0x4e8   : > { %v3051_v0 = vpop.eup %3050  ;;  %2211 = vst [vmem:[#allocation10 + $0x88] sm:$0xff] %v2179_v44  ;;  %v2105_v53 = vmul.f32 0.6931472, %v3049_v35  ;;  %v2077_v48 = vpop.xlane.xlu1 %2076 }
 0x4e9   : > { %v2079_v56 = vpop.xlane.xlu0 %2078  ;;  %2212 = vst [vmem:[#allocation10 + $0x90] sm:$0xff] %v2180_v52  ;;  %v2107_v49 = vmul.f32 0.6931472, %v3051_v0  ;;  %3060 = vlog2.f32 %v2077_v48 }
 0x4ea   : > { %v2165_v36 = vsub.f32 %v3681_v7, %v2105_v53  ;;  %3062 = vlog2.f32 %v2079_v56 }
 0x4eb   : > { %v3053_v59 = vpop.eup %3052  ;;  %v2166_v41 = vsub.f32 %v3692_v18, %v2107_v49 }
 0x4ec   : > { %v3055_v60 = vpop.eup %3054  ;;  %2197 = vst [vmem:[#allocation10 + $0x18] sm:$0xff] %v2165_v36  ;;  %v2137_v8 = vmul.f32 0.6931472, %v3053_v59  ;;  %v2049_v1 = vpop.xlane.xlu1 %2048 }
 0x4ed   : > { %v2051_v3 = vpop.xlane.xlu0 %2050  ;;  %2198 = vst [vmem:[#allocation10 + $0x20] sm:$0xff] %v2166_v41  ;;  %v2139_v58 = vmul.f32 0.6931472, %v3055_v60  ;;  %3064 = vlog2.f32 %v2049_v1 }
 0x4ee   : > { %v2181_v63 = vsub.f32 %v3689_v17, %v2137_v8  ;;  %3066 = vlog2.f32 %v2051_v3 }
 0x4ef   : > { %v3057_v4 = vpop.eup %3056  ;;  %v2182_v9 = vsub.f32 %v3700_v28, %v2139_v58 }
 0x4f0   : > { %v3059_v10 = vpop.eup %3058  ;;  %2213 = vst [vmem:[#allocation10 + $0x98] sm:$0xff] %v2181_v63  ;;  %v2109_v7 = vmul.f32 0.6931472, %v3057_v4  ;;  %v2081_v11 = vpop.xlane.xlu1 %2080 }
 0x4f1   : > { %v2083_v12 = vpop.xlane.xlu0 %2082  ;;  %2214 = vst [vmem:[#allocation10 + $0xa0] sm:$0xff] %v2182_v9  ;;  %v2111_v18 = vmul.f32 0.6931472, %v3059_v10  ;;  %3068 = vlog2.f32 %v2081_v11 }
 0x4f2   : > { %v2167_v14 = vsub.f32 %v3697_v27, %v2109_v7  ;;  %3070 = vlog2.f32 %v2083_v12 }
 0x4f3   : > { %v3061_v21 = vpop.eup %3060  ;;  %v2168_v22 = vsub.f32 %v3708_v54, %v2111_v18 }
 0x4f4   : > { %v3063_v19 = vpop.eup %3062  ;;  %2199 = vst [vmem:[#allocation10 + $0x28] sm:$0xff] %v2167_v14  ;;  %v2141_v17 = vmul.f32 0.6931472, %v3061_v21  ;;  %v2053_v24 = vpop.xlane.xlu1 %2052 }
 0x4f5   : > { %v2055_v25 = vpop.xlane.xlu0 %2054  ;;  %2200 = vst [vmem:[#allocation10 + $0x30] sm:$0xff] %v2168_v22  ;;  %v2143_v28 = vmul.f32 0.6931472, %v3063_v19  ;;  %3072 = vlog2.f32 %v2053_v24 }
 0x4f6   : > { %v2183_v40 = vsub.f32 %v3705_v43, %v2141_v17  ;;  %3074 = vlog2.f32 %v2055_v25 }
 0x4f7   : > { %v3065_v42 = vpop.eup %3064  ;;  %v2184_v51 = vsub.f32 %v3716_v38, %v2143_v28 }
 0x4f8   : > { %v3067_v30 = vpop.eup %3066  ;;  %2215 = vst [vmem:[#allocation10 + $0xa8] sm:$0xff] %v2183_v40  ;;  %v2113_v27 = vmul.f32 0.6931472, %v3065_v42  ;;  %v2085_v31 = vpop.xlane.xlu1 %2084 }
 0x4f9   : > { %v2087_v37 = vpop.xlane.xlu0 %2086  ;;  %2216 = vst [vmem:[#allocation10 + $0xb0] sm:$0xff] %v2184_v51  ;;  %v2115_v54 = vmul.f32 0.6931472, %v3067_v30  ;;  %3076 = vlog2.f32 %v2085_v31 }
 0x4fa   : > { %v2169_v57 = vsub.f32 %v3713_v26, %v2113_v27  ;;  %3078 = vlog2.f32 %v2087_v37 }
 0x4fb   : > { %v3069_v47 = vpop.eup %3068  ;;  %v2170_v16 = vsub.f32 %v3724_v20, %v2115_v54 }
 0x4fc   : > { %v3071_v46 = vpop.eup %3070  ;;  %2201 = vst [vmem:[#allocation10 + $0x38] sm:$0xff] %v2169_v57  ;;  %v2145_v43 = vmul.f32 0.6931472, %v3069_v47  ;;  %v2057_v44 = vpop.xlane.xlu1 %2056 }
 0x4fd   : > { %v2059_v35 = vpop.xlane.xlu0 %2058  ;;  %2202 = vst [vmem:[#allocation10 + $0x40] sm:$0xff] %v2170_v16  ;;  %v2147_v38 = vmul.f32 0.6931472, %v3071_v46  ;;  %3080 = vlog2.f32 %v2057_v44 }
 0x4fe   : > { %v2185_v52 = vsub.f32 %v3721_v2, %v2145_v43  ;;  %3082 = vlog2.f32 %v2059_v35 }
 0x4ff   : > { %v3073_v0 = vpop.eup %3072  ;;  %v2186_v53 = vsub.f32 %v3732_v34, %v2147_v38 }
 0x500   : > { %v3075_v48 = vpop.eup %3074  ;;  %2217 = vst [vmem:[#allocation10 + $0xb8] sm:$0xff] %v2185_v52  ;;  %v2117_v26 = vmul.f32 0.6931472, %v3073_v0  ;;  %v2089_v56 = vpop.xlane.xlu1 %2088 }
 0x501   : > { %v2091_v49 = vpop.xlane.xlu0 %2090  ;;  %2218 = vst [vmem:[#allocation10 + $0xc0] sm:$0xff] %v2186_v53  ;;  %v2119_v20 = vmul.f32 0.6931472, %v3075_v48  ;;  %3084 = vlog2.f32 %v2089_v56 }
 0x502   : > { %v2171_v36 = vsub.f32 %v3729_v15, %v2117_v26  ;;  %3086 = vlog2.f32 %v2091_v49 }
 0x503   : > { %v3077_v59 = vpop.eup %3076  ;;  %v2172_v41 = vsub.f32 %v3740_v61, %v2119_v20 }
 0x504   : > { %v3079_v60 = vpop.eup %3078  ;;  %2203 = vst [vmem:[#allocation10 + $0x48] sm:$0xff] %v2171_v36  ;;  %v2149_v2 = vmul.f32 0.6931472, %v3077_v59  ;;  %v2061_v8 = vpop.xlane.xlu1 %2060 }
 0x505   : > { %v2063_v1 = vpop.xlane.xlu0 %2062  ;;  %2204 = vst [vmem:[#allocation10 + $0x50] sm:$0xff] %v2172_v41  ;;  %v2151_v34 = vmul.f32 0.6931472, %v3079_v60  ;;  %3088 = vlog2.f32 %v2061_v8 }
 0x506   : > { %v2187_v3 = vsub.f32 %v3737_v32, %v2149_v2  ;;  %3090 = vlog2.f32 %v2063_v1 }
 0x507   : > { %v3081_v58 = vpop.eup %3080  ;;  %v2188_v63 = vsub.f32 %v3748_v5, %v2151_v34 }
 0x508   : > { %v3083_v4 = vpop.eup %3082  ;;  %2219 = vst [vmem:[#allocation10 + $0xc8] sm:$0xff] %v2187_v3  ;;  %v2121_v15 = vmul.f32 0.6931472, %v3081_v58  ;;  %v2093_v9 = vpop.xlane.xlu1 %2092 }
 0x509   : > { %v2095_v10 = vpop.xlane.xlu0 %2094  ;;  %2220 = vst [vmem:[#allocation10 + $0xd0] sm:$0xff] %v2188_v63  ;;  %v2123_v61 = vmul.f32 0.6931472, %v3083_v4  ;;  %3092 = vlog2.f32 %v2093_v9 }
 0x50a   : > { %v2173_v7 = vsub.f32 %v3745_v55, %v2121_v15  ;;  %3094 = vlog2.f32 %v2095_v10 }
 0x50b   : > { %v3085_v11 = vpop.eup %3084  ;;  %v2174_v12 = vsub.f32 %v3756_v33, %v2123_v61 }
 0x50c   : > { %v3087_v18 = vpop.eup %3086  ;;  %2205 = vst [vmem:[#allocation10 + $0x58] sm:$0xff] %v2173_v7  ;;  %v2153_v32 = vmul.f32 0.6931472, %v3085_v11  ;;  %v2065_v14 = vpop.xlane.xlu1 %2064 }
 0x50d   : > { %2206 = vst [vmem:[#allocation10 + $0x60] sm:$0xff] %v2174_v12  ;;  %v2155_v5 = vmul.f32 0.6931472, %v3087_v18  ;;  %3096 = vlog2.f32 %v2065_v14 }
 0x50e   : > { %v2189_v21 = vsub.f32 %v3753_v6, %v2153_v32 }
 0x50f   : > { %v3089_v22 = vpop.eup %3088  ;;  %v2190_v19 = vsub.f32 %v3764_v50, %v2155_v5 }
 0x510   : > { %v3091_v17 = vpop.eup %3090  ;;  %2221 = vst [vmem:[#allocation10 + $0xd8] sm:$0xff] %v2189_v21  ;;  %v2125_v24 = vmul.f32 0.6931472, %v3089_v22  ;;  %v2097_v55 = vpop.xlane.xlu1 %2096 }
 0x511   : > { %2222 = vst [vmem:[#allocation10 + $0xe0] sm:$0xff] %v2190_v19  ;;  %v2127_v25 = vmul.f32 0.6931472, %v3091_v17  ;;  %3098 = vlog2.f32 %v2097_v55 }
 0x512   : > { %v2175_v33 = vsub.f32 %v3761_v23, %v2125_v24 }
 0x513   : > { %v3093_v28 = vpop.eup %3092  ;;  %v2176_v40 = vsub.f32 %v3772_v13, %v2127_v25 }
 0x514   : > { %v3095_v42 = vpop.eup %3094  ;;  %2207 = vst [vmem:[#allocation10 + $0x68] sm:$0xff] %v2175_v33  ;;  %v2157_v51 = vmul.f32 0.6931472, %v3093_v28 }
 0x515   : > { %2208 = vst [vmem:[#allocation10 + $0x70] sm:$0xff] %v2176_v40  ;;  %v2159_v6 = vmul.f32 0.6931472, %v3095_v42 }
 0x516   : > { %v2191_v30 = vsub.f32 %v3769_v45, %v2157_v51 }
 0x517   : > { %v3097_v50 = vpop.eup %3096  ;;  %v2192_v27 = vsub.f32 %v3777_v29, %v2159_v6 }
 0x518   : > { %2223 = vst [vmem:[#allocation10 + $0xe8] sm:$0xff] %v2191_v30  ;;  %v2129_v31 = vmul.f32 0.6931472, %v3097_v50 }
 0x519   : > { %2224 = vst [vmem:[#allocation10 + $0xf0] sm:$0xff] %v2192_v27 }
 0x51a   : > { %v2177_v37 = vsub.f32 %v3780_v62, %v2129_v31 }
 0x51b   : > { %v3099_v54 = vpop.eup %3098 }
 0x51c   : > { %2209 = vst [vmem:[#allocation10 + $0x78] sm:$0xff] %v2177_v37  ;;  %v2161_v23 = vmul.f32 0.6931472, %v3099_v54 }
 0x51e   : > { %v2193_v13 = vsub.f32 %v3785_v39, %v2161_v23 }
 0x520   : > { %2225 = vst [vmem:[#allocation10 + $0xf8] sm:$0xff] %v2193_v13 }
 0x521 PF: > { %p3822_p6 = scmp.eq.s32.totalorder %s2344_s23, 1  ;;  %s3254_s14 = smov [#allocation10]  }
 0x522   : > { %s2241_s15 = sshll.u32 %s3254_s14, 4  ;;  %s2242_s15 = int_to_ptr.vmem [resolvable:$true] %s2241_s15 }
 0x523   : > { %s3184_s16 = scalar_lea.vmem %s2242_s15, 4096  ;;  %s3190_s17 = scalar_lea.vmem %s2242_s15, 8192 }
 0x524   : > { %p3185_p9 = scmp.ne.s32.totalorder %s2242_s15, %s3184_s16  ;;  %p3191_p12 = scmp.lt.s32.totalorder %s2242_s15, %s2242_s15 }
 0x525   : > { %p3192_p13 = scmp.lt.s32.totalorder %s3190_s17, %s3184_s16 }
 0x526   : > { %p3186_p10 = pnand %p3185_p9, %p3822_p6 }
 0x527   : > { %p3193_p0 = por %p3192_p13, %p3191_p12 }
 0x528   : > { %p3187_p11 = pneg %p3186_p10 }
 0x52a   : > { %p3194_p1 = pnand %p3193_p0, %p3187_p11 }
 0x52c   : > { %3197 = shalt.err (!%p3194_p1)
}
 0x52d   : > { %s3198_s6 = scalar_lea.hbm %s3861_s5, 4096 }
 0x52e   : > { %p3199_p4 = scmp.ne.s32.totalorder %s3861_s5, %s3198_s6  ;;  %p3204_p8 = scmp.lt.u32.totalorder %s3198_s6, %s3861_s5 }
 0x530   : > { %p3200_p7 = pnand %p3199_p4, %p3822_p6 }
 0x532   : > { %p3201_p2 = pneg %p3200_p7 }
 0x534   : > { %p3206_p5 = pnand %p3204_p8, %p3201_p2 }
 0x536   : > { %3209 = shalt.err (!%p3206_p5)
}
 0x537   : > { %s3255_s12 = smov 128   ;;  %s3256_s13 = smov 8  }
 0x538   : > { %2791 = dma.vmem_to_hbm [thread:$0]  (%p3822_p6), %s2242_s15, 4096, %s3861_s5, [#allocation6], %s3255_s12, %s3255_s12, %s3256_s13  }
 0x539 PF: > { %p2815_p3 = scmp.ge.s32.totalorder %s3244_s20, 2  ;;  %s3874_s24 = sadd.s32 4294967294, %s3244_s20  }
 0x53a   : > { %p2816_p9 = scmp.eq.s32.totalorder %s3874_s24, 1 }
 0x53c   : > { %p2805_p10 = pnand %p2816_p9, %p2815_p3 }
 0x53e   : > { %3231 = dma.done.wait (!%p2805_p10), [#allocation6], 4096  }
 0x53f   : > { %3233 = vsyncadd (!%p2805_p10), [#allocation6], 4294963200  ;;  %s20_s20 = sadd.s32 1, %s3244_s20   ;;  %s3875_s18 = smov %s3240_s19 }
 0x540   : > { %p17_p11 = scmp.ge.s32.totalorder %s20_s20, 4   ;;  %s3876_s19 = smov %s3878_s28 }
 0x542   :  { %19 = sbr.rel (!%p17_p11) target bundleno = 5 (0x5), region = 109 }
 0x549   :  { %2262 = vsyncpa [#allocation5], 1 }
 0x54a   :  { %2264 = vsyncpa [#allocation5 + $0x1], 1 }
 0x54b   :  { %2265 = vsyncpa [#allocation8], 1 }
 0x54c   :  { %2266 = vsyncpa [#allocation6], 1 }
 0x54d   :  { %2268 = vsyncpa [#allocation6 + $0x1], 1 }

</bundles_post_ra>
